<compile_context>
chip_gen: v6e
topology: v6e:2x2x1
jax: 0.10.0
libtpu: 0.0.40
codegen_flags: <defaults>
</compile_context>

<pallas_src>
import functools

import jax
import jax.numpy as jnp
from jax.experimental import pallas as pl
from jax.experimental.pallas import tpu as pltpu


def _euclidean_kernel(x_ref, y_ref, w2_ref, s_ref, o_ref, *, neg_inv_phi):
    # x_ref, y_ref: (block_rows, L) f32 packed rows
    # w2_ref:       (1, L) f32 squared weights (tiled across the P groups)
    # s_ref:        (L, P) bf16 0/1 group-indicator matrix
    # o_ref:        (block_rows, P) f32
    diff = x_ref[...] - y_ref[...]                 # VPU
    d2 = diff * diff * w2_ref[...]                 # (block_rows, L), exact f32

    # Grouped reduction over each row's D-lane groups via the MXU.
    # bf16 hi/lo split keeps the group sums f32-accurate with bf16 operands.
    hi = d2.astype(jnp.bfloat16)
    lo = (d2 - hi.astype(jnp.float32)).astype(jnp.bfloat16)
    s = s_ref[...]
    sq = (jnp.dot(hi, s, preferred_element_type=jnp.float32)
          + jnp.dot(lo, s, preferred_element_type=jnp.float32))   # (block_rows, P)

    o_ref[...] = jnp.exp(sq * neg_inv_phi)         # EUP exp, fused -1/phi scale


def _euclidean_reference(x, y, w, phi):
    d2 = jnp.sum(((x - y) * w) ** 2, axis=2)
    return jnp.exp(-d2 / phi)


def _round_up(n, m):
    return ((n + m - 1) // m) * m


def euclidean_model_forward(x, y, dimension_weights, phi=10.0,
                            target_block_bytes=4 * 1024 * 1024,
                            min_elements_for_pallas=4096):
    """EuclideanModel forward: x, y (B, N, D); dimension_weights (D,) -> (B, N)."""
    B, N, D = x.shape
    assert y.shape == (B, N, D) and dimension_weights.shape == (D,)
    R = B * N

    w = dimension_weights.astype(jnp.float32)
    x32 = x.astype(jnp.float32)
    y32 = y.astype(jnp.float32)

    if R * D < min_elements_for_pallas:
        # Tiny problem: pallas_call launch/pipeline overhead dominates; let XLA fuse.
        return _euclidean_reference(x32, y32, w, float(phi))

    x_rows = x32.reshape(R, D)
    y_rows = y32.reshape(R, D)

    # Pack P rows per 128-lane row when D divides 128 (free, contiguous reshape).
    # Otherwise fall back to one row per sublane row (still correct).
    P = 128 // D if (D <= 128 and 128 % D == 0) else 1
    L = P * D

    # Block sizing: ~target_block_bytes per input per grid step, sublane-aligned,
    # with minimal zero padding of the row count (handles ragged B*N).
    rp_needed = pl.cdiv(R, P)                       # packed rows needed
    rows_max = max(8, (target_block_bytes // (L * 4)) // 8 * 8)
    num_blocks = pl.cdiv(rp_needed, rows_max)
    block_rows = _round_up(pl.cdiv(rp_needed, num_blocks), 8)
    rp = num_blocks * block_rows
    r_pad = rp * P

    if r_pad != R:                                  # pad only when needed (copy)
        pad = ((0, r_pad - R), (0, 0))
        x_rows = jnp.pad(x_rows, pad)
        y_rows = jnp.pad(y_rows, pad)

    x_packed = x_rows.reshape(rp, L)                # free reshapes
    y_packed = y_rows.reshape(rp, L)

    # Squared weights tiled across the P packed groups: (1, L) f32.
    w2 = jnp.tile(w * w, P).reshape(1, L)
    # Group indicator: s[j, k] = 1 iff lane j belongs to packed group k.
    s = (jnp.arange(L)[:, None] // D == jnp.arange(P)[None, :]).astype(jnp.bfloat16)

    out_packed = pl.pallas_call(
        functools.partial(_euclidean_kernel, neg_inv_phi=-1.0 / float(phi)),
        out_shape=jax.ShapeDtypeStruct((rp, P), jnp.float32),
        grid=(num_blocks,),
        in_specs=[
            pl.BlockSpec((block_rows, L), lambda i: (i, 0)),   # x packed rows
            pl.BlockSpec((block_rows, L), lambda i: (i, 0)),   # y packed rows
            pl.BlockSpec((1, L), lambda i: (0, 0)),            # w^2 (replicated)
            pl.BlockSpec((L, P), lambda i: (0, 0)),            # group indicator
        ],
        out_specs=pl.BlockSpec((block_rows, P), lambda i: (i, 0)),
        compiler_params=pltpu.CompilerParams(
            dimension_semantics=("parallel",),   # megacore-shard the row axis on v7x
            vmem_limit_bytes=32 * 1024 * 1024,   # ~24 MiB used; fits v5e/v6e/v7x
        ),
    )(x_packed, y_packed, w2, s)

    return out_packed.reshape(r_pad)[:R].reshape(B, N)


if __name__ == "__main__":
    # Small shapes consistent with the module: (B, N, D), reduction over D.
    # N is deliberately not a multiple of the packing factor / sublane count so
    # the ragged-row padding path is exercised.
    B, N, D = 2, 1000, 32

    key = jax.random.PRNGKey(0)
    kx, ky = jax.random.split(key)
    x = jax.random.normal(kx, (B, N, D), dtype=jnp.float32)
    y = jax.random.normal(ky, (B, N, D), dtype=jnp.float32)

    # nn.Parameter(torch.empty(D).uniform_(1, 1)) -> all ones (deterministic).
    dimension_weights = jnp.ones((D,), dtype=jnp.float32)
    phi = 10.0  # self.phi = torch.tensor(10.0)

    out = euclidean_model_forward(x, y, dimension_weights, phi)
    out = jax.block_until_ready(out)

    # Pure-JAX reference of the exact PyTorch semantics.
    dist = jnp.linalg.norm((x - y) * dimension_weights, ord=2, axis=2)
    ref = jnp.exp(-dist ** 2 / phi)
    assert out.shape == (B, N)
    err = float(jnp.max(jnp.abs(out - ref)))
    assert bool(jnp.allclose(out, ref, atol=1e-5, rtol=1e-4)), err

    print("KERNEL_OK")
</pallas_src>

<mosaic_0001>
module attributes {stable_mosaic.version = 11 : i64} {
  func.func @_euclidean_kernel(%arg0: i32, %arg1: memref<504x128xf32, #tpu.memory_space<vmem>>, %arg2: memref<504x128xf32, #tpu.memory_space<vmem>>, %arg3: memref<1x128xf32, #tpu.memory_space<vmem>>, %arg4: memref<128x4xbf16, #tpu.memory_space<vmem>>, %arg5: memref<504x4xf32, #tpu.memory_space<vmem>>) attributes {dimension_semantics = [#tpu.dimension_semantics<parallel>], iteration_bounds = array<i64: 1>, scalar_prefetch = 0 : i64, scratch_operands = 0 : i64, tpu.core_type = #tpu.core_type<tc>, window_params = [{transform_indices = @transform_0, window_bounds = array<i64: 504, 128>}, {transform_indices = @transform_1, window_bounds = array<i64: 504, 128>}, {pipeline_mode = #tpu.pipeline_mode<synchronous>, transform_indices = @transform_2, window_bounds = array<i64: 1, 128>}, {pipeline_mode = #tpu.pipeline_mode<synchronous>, transform_indices = @transform_3, window_bounds = array<i64: 128, 4>}, {transform_indices = @transform_4, window_bounds = array<i64: 504, 4>}]} {
    %c0 = arith.constant 0 : index
    %c0_0 = arith.constant 0 : index
    %0 = vector.load %arg1[%c0, %c0_0] : memref<504x128xf32, #tpu.memory_space<vmem>>, vector<504x128xf32>
    %c0_1 = arith.constant 0 : index
    %c0_2 = arith.constant 0 : index
    %1 = vector.load %arg2[%c0_1, %c0_2] : memref<504x128xf32, #tpu.memory_space<vmem>>, vector<504x128xf32>
    %2 = arith.subf %0, %1 : vector<504x128xf32>
    %3 = arith.mulf %2, %2 : vector<504x128xf32>
    %c0_3 = arith.constant 0 : index
    %c0_4 = arith.constant 0 : index
    %4 = vector.load %arg3[%c0_3, %c0_4] : memref<1x128xf32, #tpu.memory_space<vmem>>, vector<1x128xf32>
    %5 = vector.broadcast %4 : vector<1x128xf32> to vector<504x128xf32>
    %6 = arith.mulf %3, %5 : vector<504x128xf32>
    %7 = arith.truncf %6 : vector<504x128xf32> to vector<504x128xbf16>
    %8 = arith.extf %7 : vector<504x128xbf16> to vector<504x128xf32>
    %9 = arith.subf %6, %8 : vector<504x128xf32>
    %10 = arith.truncf %9 : vector<504x128xf32> to vector<504x128xbf16>
    %c0_5 = arith.constant 0 : index
    %c0_6 = arith.constant 0 : index
    %11 = vector.load %arg4[%c0_5, %c0_6] : memref<128x4xbf16, #tpu.memory_space<vmem>>, vector<128x4xbf16>
    %cst = arith.constant dense<0.000000e+00> : vector<504x4xf32>
    %12 = tpu.matmul %7, %11, %cst {dimension_numbers = #tpu.dot_dimension_numbers<[1], [0], [0], [1], [0, 0, 1, 1], [], []>} : vector<504x128xbf16>, vector<128x4xbf16>, vector<504x4xf32> -> vector<504x4xf32>
    %cst_7 = arith.constant dense<0.000000e+00> : vector<504x4xf32>
    %13 = tpu.matmul %10, %11, %cst_7 {dimension_numbers = #tpu.dot_dimension_numbers<[1], [0], [0], [1], [0, 0, 1, 1], [], []>} : vector<504x128xbf16>, vector<128x4xbf16>, vector<504x4xf32> -> vector<504x4xf32>
    %14 = arith.addf %12, %13 : vector<504x4xf32>
    %cst_8 = arith.constant -1.000000e-01 : f32
    %15 = vector.broadcast %cst_8 : f32 to vector<504x4xf32>
    %16 = arith.mulf %14, %15 : vector<504x4xf32>
    %17 = math.exp %16 : vector<504x4xf32>
    %c0_9 = arith.constant 0 : index
    %c0_10 = arith.constant 0 : index
    %18 = vector.load %arg5[%c0_9, %c0_10] : memref<504x4xf32, #tpu.memory_space<vmem>>, vector<504x4xf32>
    tpu.vector_store %arg5[%c0_9, %c0_10], %17 {strides = array<i32>} : memref<504x4xf32, #tpu.memory_space<vmem>>, vector<504x4xf32>,
    return
  }
  func.func @transform_0(%arg0: i32) -> (i32, i32) {
    %c0_i32 = arith.constant 0 : i32
    %c0_i32_0 = arith.constant 0 : i32
    return %arg0, %c0_i32 : i32, i32
  }
  func.func @transform_1(%arg0: i32) -> (i32, i32) {
    %c0_i32 = arith.constant 0 : i32
    %c0_i32_0 = arith.constant 0 : i32
    return %arg0, %c0_i32 : i32, i32
  }
  func.func @transform_2(%arg0: i32) -> (i32, i32) {
    %c0_i32 = arith.constant 0 : i32
    %c0_i32_0 = arith.constant 0 : i32
    %c0_i32_1 = arith.constant 0 : i32
    return %c0_i32, %c0_i32_0 : i32, i32
  }
  func.func @transform_3(%arg0: i32) -> (i32, i32) {
    %c0_i32 = arith.constant 0 : i32
    %c0_i32_0 = arith.constant 0 : i32
    %c0_i32_1 = arith.constant 0 : i32
    return %c0_i32, %c0_i32_0 : i32, i32
  }
  func.func @transform_4(%arg0: i32) -> (i32, i32) {
    %c0_i32 = arith.constant 0 : i32
    %c0_i32_0 = arith.constant 0 : i32
    return %arg0, %c0_i32 : i32, i32
  }
}

</mosaic_0001>

<bundles_post_ra>
// kernel: tpu_custom_call.1
= control target key start
LH: loop header
LB: loop body
LE: loop exit
PB: predicated region body
PF: predicated region fallthrough
CT: control target
= control target key end

     0   :  { %9 = vsyncpa [#allocation3], 0  ;;  %s2399_s0 = inlined_call_operand.hbm [shape: f32[504,128], index: 0, kind: input, shape index: {}]   ;;  %s2400_s1 = inlined_call_operand.hbm [shape: f32[504,128], index: 1, kind: input, shape index: {}]   ;;  %s2401_s2 = inlined_call_operand.vmem [shape: f32[1,128], index: 2, kind: input, shape index: {}]   ;;  %s2402_s3 = inlined_call_operand.vmem [shape: bf16[128,4], index: 3, kind: input, shape index: {}]   ;;  %s2403_s4 = inlined_call_operand.vmem [shape: f32[504,4], index: 4, kind: output, shape index: {}]  }
   0x1   :  { %10 = vsyncpa [#allocation5], 0  ;;  %s1889_s15 = smov [#allocation2]  }
   0x2   :  { %s16_s16 = sshll.u32 %s1889_s15, 4  ;;  %s17_s16 = int_to_ptr.vmem [resolvable:$true] %s16_s16 }
   0x3   :  { %s1853_s17 = scalar_lea.vmem %s17_s16, 8064  ;;  %p1858_p1 = scmp.lt.s32.totalorder %s17_s16, %s17_s16 }
   0x4   :  { %p1854_p0 = scmp.ne.s32.totalorder %s17_s16, %s1853_s17  ;;  %p1859_p2 = scmp.lt.s32.totalorder %s1853_s17, %s1853_s17 }
   0x6   :  { %p1860_p3 = por %p1859_p2, %p1858_p1 }
   0x8   :  { %p1861_p4 = pnand %p1860_p3, %p1854_p0 }
   0xa   :  { %1864 = shalt.err (!%p1861_p4)
}
   0xb   :  { %s1890_s18 = smov 128   ;;  %s1891_s19 = smov 8  }
   0xc   :  { %22 = dma.hbm_to_vmem [thread:$0]  %s2399_s0, 8064, %s17_s16, [#allocation3], %s1890_s18, %s1890_s18, %s1891_s19  }
   0xd   :  { %s1892_s22 = smov [#allocation4]  }
   0xe   :  { %s28_s23 = sshll.u32 %s1892_s22, 4  ;;  %s29_s23 = int_to_ptr.vmem [resolvable:$true] %s28_s23 }
   0xf   :  { %s1873_s24 = scalar_lea.vmem %s29_s23, 8064  ;;  %p1878_p6 = scmp.lt.s32.totalorder %s29_s23, %s29_s23 }
  0x10   :  { %p1874_p5 = scmp.ne.s32.totalorder %s29_s23, %s1873_s24  ;;  %p1879_p7 = scmp.lt.s32.totalorder %s1873_s24, %s1873_s24 }
  0x12   :  { %p1880_p8 = por %p1879_p7, %p1878_p6 }
  0x14   :  { %p1881_p9 = pnand %p1880_p8, %p1874_p5 }
  0x16   :  { %1884 = shalt.err (!%p1881_p9)
}
  0x17   :  { %34 = dma.hbm_to_vmem [thread:$0]  %s2400_s1, 8064, %s29_s23, [#allocation5], %s1890_s18, %s1890_s18, %s1891_s19  }
  0x18   :  { %1885 = dma.done.wait [#allocation3], 8064  }
  0x19   :  { %1886 = vsyncadd [#allocation3], 4294959232 }
  0x1a   :  { %1887 = dma.done.wait [#allocation5], 8064  }
  0x1b   :  { %1888 = vsyncadd [#allocation5], 4294959232  ;;  %v1710_v0 = vld [vmem:[%s2402_s3 + $0x38] sm:$0xff]   ;;  %v1711_v1 = vld [vmem:[%s2402_s3 + $0x30] sm:$0xff]   ;;  %vm1387_vm0 = vcmask 31744  }
  0x1c   :  { %1546 = vmatprep.subr.bf16.mxu0 %v1710_v0  ;;  %1626 = vmatprep.subr.bf16.mxu1 %v1710_v0  ;;  %v1712_v2 = vld [vmem:[%s2402_s3 + $0x28] sm:$0xff]   ;;  %v1713_v3 = vld [vmem:[%s2402_s3 + $0x20] sm:$0xff]   ;;  %v109_v6 = vld [vmem:[#allocation4] sm:$0xff] }
  0x1d   :  { %1547 = vmatpush3.bf16.msra.mxu0 %v1710_v0  ;;  %1627 = vmatpush3.bf16.msra.mxu1 %v1710_v0  ;;  %v46_v4 = vld [vmem:[#allocation2] sm:$0xff]  ;;  %v47_v5 = vld [vmem:[#allocation2 + $0x8] sm:$0xff]  ;;  %v48_v10 = vld [vmem:[#allocation2 + $0x10] sm:$0xff] }
  0x1e   :  { %1548 = vmatprep.subr.bf16.mxu0 %v1711_v1  ;;  %1628 = vmatprep.subr.bf16.mxu1 %v1711_v1  ;;  %v110_v7 = vld [vmem:[#allocation4 + $0x8] sm:$0xff]  ;;  %v172_v8 = vsub.f32 %v46_v4, %v109_v6  ;;  %v1714_v11 = vld [vmem:[%s2402_s3 + $0x18] sm:$0xff]   ;;  %v111_v14 = vld [vmem:[#allocation4 + $0x10] sm:$0xff] }
  0x1f   :  { %v1939_v9 = vld [vmem:[%s2401_s2] ss:$0 sm:$0xff]  ;;  %v173_v12 = vsub.f32 %v47_v5, %v110_v7  ;;  %v49_v13 = vld [vmem:[#allocation2 + $0x18] sm:$0xff]  ;;  %v112_v15 = vld [vmem:[#allocation4 + $0x18] sm:$0xff]  ;;  %v174_v17 = vsub.f32 %v48_v10, %v111_v14 }
  0x20   :  { %v235_v16 = vmul.f32 %v172_v8, %v172_v8  ;;  %v175_v18 = vsub.f32 %v49_v13, %v112_v15  ;;  %v50_v19 = vld [vmem:[#allocation2 + $0x20] sm:$0xff]  ;;  %v51_v20 = vld [vmem:[#allocation2 + $0x28] sm:$0xff]  ;;  %v113_v21 = vld [vmem:[#allocation4 + $0x20] sm:$0xff] }
  0x21   :  { %1549 = vmatpush3.bf16.msra.mxu0 %v1711_v1  ;;  %1629 = vmatpush3.bf16.msra.mxu1 %v1711_v1  ;;  %v236_v22 = vmul.f32 %v173_v12, %v173_v12  ;;  %v114_v23 = vld [vmem:[#allocation4 + $0x28] sm:$0xff]  ;;  %v176_v24 = vsub.f32 %v50_v19, %v113_v21  ;;  %v52_v25 = vld [vmem:[#allocation2 + $0x30] sm:$0xff]  ;;  %v53_v26 = vld [vmem:[#allocation2 + $0x38] sm:$0xff]  ;;  %v237_v28 = vmul.f32 %v174_v17, %v174_v17 }
  0x22   :  { %1550 = vmatprep.subr.bf16.mxu0 %v1712_v2  ;;  %1630 = vmatprep.subr.bf16.mxu1 %v1712_v2  ;;  %v305_v27 = vmul.f32 %v1939_v9, %v235_v16  ;;  %v238_v29 = vmul.f32 %v175_v18, %v175_v18  ;;  %v177_v30 = vsub.f32 %v51_v20, %v114_v23  ;;  %v115_v31 = vld [vmem:[#allocation4 + $0x30] sm:$0xff]  ;;  %v116_v32 = vld [vmem:[#allocation4 + $0x38] sm:$0xff]  ;;  %v54_v37 = vld [vmem:[#allocation2 + $0x40] sm:$0xff] }
  0x23   :  { %v306_v33 = vmul.f32 %v1939_v9, %v236_v22  ;;  %v239_v34 = vmul.f32 %v176_v24, %v176_v24  ;;  %v178_v35 = vsub.f32 %v52_v25, %v115_v31  ;;  %v179_v36 = vsub.f32 %v53_v26, %v116_v32  ;;  %v117_v38 = vld [vmem:[#allocation4 + $0x40] sm:$0xff]  ;;  %v55_v42 = vld [vmem:[#allocation2 + $0x48] sm:$0xff]  ;;  %v118_v43 = vld [vmem:[#allocation4 + $0x48] sm:$0xff] }
  0x24   :  { %v307_v39 = vmul.f32 %v1939_v9, %v237_v28  ;;  %v308_v40 = vmul.f32 %v1939_v9, %v238_v29  ;;  %v240_v41 = vmul.f32 %v177_v30, %v177_v30  ;;  %v1715_v44 = vld [vmem:[%s2402_s3 + $0x10] sm:$0xff]   ;;  %v180_v51 = vsub.f32 %v54_v37, %v117_v38  ;;  %v1716_v57 = vld [vmem:[%s2402_s3 + $0x8] sm:$0xff]   ;;  %v57_v63 = vld [vmem:[#allocation2 + $0x58] sm:$0xff] }
  0x25   :  { %1551 = vmatpush3.bf16.msra.mxu0 %v1712_v2  ;;  %1631 = vmatpush3.bf16.msra.mxu1 %v1712_v2  ;;  %v368_v45 = vpack.c.bf16 %v306_v33, %v305_v27  ;;  %v309_v46 = vmul.f32 %v1939_v9, %v239_v34  ;;  %v241_v47 = vmul.f32 %v178_v35, %v178_v35  ;;  %v56_v62 = vld [vmem:[#allocation2 + $0x50] sm:$0xff]  ;;  %v58_v5 = vld [vmem:[#allocation2 + $0x60] sm:$0xff]  ;;  %v121_v12 = vld [vmem:[#allocation4 + $0x60] sm:$0xff] }
  0x26   :  { %1552 = vmatprep.subr.bf16.mxu0 %v1713_v3  ;;  %1632 = vmatprep.subr.bf16.mxu1 %v1713_v3  ;;  %v1952_v48 = vpack.c.bf16 %v308_v40, %v307_v39  ;;  %v310_v49 = vmul.f32 %v1939_v9, %v240_v41  ;;  %v242_v50 = vmul.f32 %v179_v36, %v179_v36  ;;  %v120_v4 = vld [vmem:[#allocation4 + $0x58] sm:$0xff]  ;;  %v122_v13 = vld [vmem:[#allocation4 + $0x68] sm:$0xff]  ;;  %v61_v28 = vld [vmem:[#allocation2 + $0x78] sm:$0xff] }
  0x27   :  { %v400_v52 = vunpack.c.l.bf16 %v368_v45  ;;  %v401_v53 = vunpack.c.h.bf16 %v368_v45  ;;  %1642 = vmatprep.mubr.bf16.mxu1 %v368_v45  ;;  %v181_v54 = vsub.f32 %v55_v42, %v118_v43  ;;  %v243_v61 = vmul.f32 %v180_v51, %v180_v51  ;;  %v1717_v15 = vld [vmem:[%s2402_s3] sm:$0xff]   ;;  %v123_v29 = vld [vmem:[#allocation4 + $0x70] sm:$0xff]  ;;  %v125_v35 = vld [vmem:[#allocation4 + $0x80] sm:$0xff] }
  0x28   :  { %v402_v55 = vunpack.c.l.bf16 %v1952_v48  ;;  %v1956_v56 = vpack.c.bf16 %v310_v49, %v309_v46  ;;  %v403_v60 = vunpack.c.h.bf16 %v1952_v48  ;;  %v1964_v1 = vmul.f32 %v1939_v9, %v241_v47  ;;  %v62_v34 = vld [vmem:[#allocation2 + $0x80] sm:$0xff]  ;;  %v63_v41 = vld [vmem:[#allocation2 + $0x88] sm:$0xff] }
  0x29   :  { %1553 = vmatpush3.bf16.msra.mxu0 %v1713_v3  ;;  %1633 = vmatpush3.bf16.msra.mxu1 %v1713_v3  ;;  %v463_v58 = vsub.f32 %v305_v27, %v400_v52  ;;  %v464_v59 = vsub.f32 %v306_v33, %v401_v53  ;;  %v1967_v2 = vmul.f32 %v1939_v9, %v242_v50  ;;  %v119_v3 = vld [vmem:[#allocation4 + $0x50] sm:$0xff]  ;;  %v60_v27 = vld [vmem:[#allocation2 + $0x70] sm:$0xff]  ;;  %v126_v42 = vld [vmem:[#allocation4 + $0x88] sm:$0xff] }
  0x2a   :  { %1554 = vmatprep.subr.bf16.mxu0 %v1714_v11  ;;  %1634 = vmatprep.subr.bf16.mxu1 %v1714_v11  ;;  %v404_v0 = vunpack.c.l.bf16 %v1956_v56  ;;  %v405_v7 = vunpack.c.h.bf16 %v1956_v56  ;;  %v244_v8 = vmul.f32 %v181_v54, %v181_v54  ;;  %v1971_v10 = vmul.f32 %v1939_v9, %v243_v61  ;;  %v124_v33 = vld [vmem:[#allocation4 + $0x78] sm:$0xff] }
  0x2b   :  { %v526_v6 = vpack.c.bf16 %v464_v59, %v463_v58  ;;  %v465_v14 = vsub.f32 %v307_v39, %v402_v55  ;;  %v466_v16 = vsub.f32 %v308_v40, %v403_v60  ;;  %v182_v18 = vsub.f32 %v56_v62, %v119_v3  ;;  %v64_v58 = vld [vmem:[#allocation2 + $0x90] sm:$0xff]  ;;  %v65_v62 = vld [vmem:[#allocation2 + $0x98] sm:$0xff] }
  0x2c   :  { %v314_v17 = vmul.f32 %v1939_v9, %v244_v8  ;;  %v1979_v19 = vpack.c.bf16 %v1967_v2, %v1964_v1  ;;  %v183_v20 = vsub.f32 %v57_v63, %v120_v4  ;;  %v184_v21 = vsub.f32 %v58_v5, %v121_v12  ;;  %v127_v63 = vld [vmem:[#allocation4 + $0x90] sm:$0xff]  ;;  %v130_v12 = vld [vmem:[#allocation4 + $0xa8] sm:$0xff] }
  0x2d   :  { %1555 = vmatpush3.bf16.msra.mxu0 %v1714_v11  ;;  %1635 = vmatpush3.bf16.msra.mxu1 %v1714_v11  ;;  %v59_v11 = vld [vmem:[#allocation2 + $0x68] sm:$0xff]  ;;  %v467_v23 = vsub.f32 %v309_v46, %v404_v0  ;;  %v468_v24 = vsub.f32 %v310_v49, %v405_v7  ;;  %v245_v26 = vmul.f32 %v182_v18, %v182_v18  ;;  %v128_v0 = vld [vmem:[#allocation4 + $0x98] sm:$0xff] }
  0x2e   :  { %1556 = vmatprep.subr.bf16.mxu0 %v1715_v44  ;;  %1636 = vmatprep.subr.bf16.mxu1 %v1715_v44  ;;  %v185_v22 = vsub.f32 %v59_v11, %v122_v13  ;;  %v1982_v25 = vpack.c.bf16 %v314_v17, %v1971_v10  ;;  %v246_v30 = vmul.f32 %v183_v20, %v183_v20  ;;  %v406_v38 = vunpack.c.l.bf16 %v1979_v19  ;;  %v67_v11 = vld [vmem:[#allocation2 + $0xa8] sm:$0xff] }
  0x2f   :  { %1562 = vmatprep.mubr.bf16.mxu0 %v526_v6  ;;  %v247_v31 = vmul.f32 %v184_v21, %v184_v21  ;;  %v315_v36 = vmul.f32 %v1939_v9, %v245_v26  ;;  %v527_v37 = vpack.c.bf16 %v466_v16, %v465_v14  ;;  %v186_v40 = vsub.f32 %v60_v27, %v123_v29  ;;  %v129_v6 = vld [vmem:[#allocation4 + $0xa0] sm:$0xff] }
  0x30   :  { %v248_v32 = vmul.f32 %v185_v22, %v185_v22  ;;  %v316_v39 = vmul.f32 %v1939_v9, %v246_v30  ;;  %v528_v43 = vpack.c.bf16 %v468_v24, %v467_v23  ;;  %v187_v45 = vsub.f32 %v61_v28, %v124_v33  ;;  %v68_v28 = vld [vmem:[#allocation2 + $0xb0] sm:$0xff]  ;;  %v131_v33 = vld [vmem:[#allocation4 + $0xb0] sm:$0xff] }
  0x31   :  { %1557 = vmatpush3.bf16.msra.mxu0 %v1715_v44  ;;  %1637 = vmatpush3.bf16.msra.mxu1 %v1715_v44  ;;  %v407_v44 = vunpack.c.h.bf16 %v1979_v19  ;;  %v188_v46 = vsub.f32 %v62_v34, %v125_v35  ;;  %v408_v47 = vunpack.c.l.bf16 %v1982_v25  ;;  %v409_v49 = vunpack.c.h.bf16 %v1982_v25  ;;  %v132_v34 = vld [vmem:[#allocation4 + $0xb8] sm:$0xff] }
  0x32   :  { %1558 = vmatprep.subr.bf16.mxu0 %v1716_v57  ;;  %1638 = vmatprep.subr.bf16.mxu1 %v1716_v57  ;;  %v317_v50 = vmul.f32 %v1939_v9, %v247_v31  ;;  %v318_v51 = vmul.f32 %v1939_v9, %v248_v32  ;;  %v1992_v52 = vpack.c.bf16 %v316_v39, %v315_v36  ;;  %v69_v32 = vld [vmem:[#allocation2 + $0xb8] sm:$0xff] }
  0x33   :  { %v249_v53 = vmul.f32 %v186_v40, %v186_v40  ;;  %v250_v54 = vmul.f32 %v187_v45, %v187_v45  ;;  %v189_v55 = vsub.f32 %v63_v41, %v126_v42  ;;  %v470_v59 = vsub.f32 %v1967_v2, %v407_v44  ;;  %v71_v41 = vld [vmem:[#allocation2 + $0xc8] sm:$0xff]  ;;  %v134_v42 = vld [vmem:[#allocation4 + $0xc8] sm:$0xff] }
  0x34   :  { %v251_v60 = vmul.f32 %v188_v46, %v188_v46  ;;  %v471_v3 = vsub.f32 %v1971_v10, %v408_v47  ;;  %v472_v4 = vsub.f32 %v314_v17, %v409_v49  ;;  %v1999_v5 = vpack.c.bf16 %v318_v51, %v317_v50 }
  0x35   :  { %1559 = vmatpush3.bf16.msra.mxu0 %v1716_v57  ;;  %1639 = vmatpush3.bf16.msra.mxu1 %v1716_v57  ;;  %v469_v57 = vsub.f32 %v1964_v1, %v406_v38  ;;  %v252_v61 = vmul.f32 %v189_v55, %v189_v55  ;;  %v66_v1 = vld [vmem:[#allocation2 + $0xa0] sm:$0xff]  ;;  %v410_v7 = vunpack.c.l.bf16 %v1992_v52  ;;  %v319_v2 = vmul.f32 %v1939_v9, %v249_v53 }
  0x36   :  { %1560 = vmatprep.subr.bf16.mxu0 %v1717_v15  ;;  %1640 = vmatprep.subr.bf16.mxu1 %v1717_v15  ;;  %v320_v8 = vmul.f32 %v1939_v9, %v250_v54  ;;  %v190_v13 = vsub.f32 %v64_v58, %v127_v63  ;;  %v191_v14 = vsub.f32 %v65_v62, %v128_v0  ;;  %v412_v18 = vunpack.c.l.bf16 %v1999_v5  ;;  %v73_v62 = vld [vmem:[#allocation2 + $0xd8] sm:$0xff]  ;;  %v135_v63 = vld [vmem:[#allocation4 + $0xd0] sm:$0xff]  ;;  %v136_v0 = vld [vmem:[#allocation4 + $0xd8] sm:$0xff] }
  0x37   :  { %v321_v10 = vmul.f32 %v1939_v9, %v251_v60  ;;  %v192_v16 = vsub.f32 %v66_v1, %v129_v6  ;;  %v530_v17 = vpack.c.bf16 %v472_v4, %v471_v3  ;;  %v413_v20 = vunpack.c.h.bf16 %v1999_v5 }
  0x38   :  { %v193_v21 = vsub.f32 %v67_v11, %v130_v12  ;;  %v473_v22 = vsub.f32 %v315_v36, %v410_v7  ;;  %v2009_v24 = vpack.c.bf16 %v320_v8, %v319_v2  ;;  %v253_v26 = vmul.f32 %v190_v13, %v190_v13  ;;  %v75_v11 = vld [vmem:[#allocation2 + $0xe8] sm:$0xff]  ;;  %v137_v12 = vld [vmem:[#allocation4 + $0xe0] sm:$0xff]  ;;  %v138_v13 = vld [vmem:[#allocation4 + $0xe8] sm:$0xff] }
  0x39   :  { %1561 = vmatpush3.bf16.msra.mxu0 %v1717_v15  ;;  %1641 = vmatpush3.bf16.msra.mxu1 %v1717_v15  ;;  %v322_v15 = vmul.f32 %v1939_v9, %v252_v61  ;;  %v254_v27 = vmul.f32 %v191_v14, %v191_v14  ;;  %v255_v30 = vmul.f32 %v192_v16, %v192_v16 }
  0x3a   :  { %v256_v31 = vmul.f32 %v193_v21, %v193_v21  ;;  %v475_v35 = vsub.f32 %v317_v50, %v412_v18  ;;  %v476_v36 = vsub.f32 %v318_v51, %v413_v20  ;;  %v415_v40 = vunpack.c.h.bf16 %v2009_v24 }
  0x3b   :  { %v2012_v29 = vpack.c.bf16 %v322_v15, %v321_v10  ;;  %v324_v44 = vmul.f32 %v1939_v9, %v254_v27  ;;  %v194_v45 = vsub.f32 %v68_v28, %v131_v33  ;;  %v195_v46 = vsub.f32 %v69_v32, %v132_v34  ;;  %v76_v27 = vld [vmem:[#allocation2 + $0xf0] sm:$0xff]  ;;  %v139_v32 = vld [vmem:[#allocation4 + $0xf0] sm:$0xff] }
  0x3c   :  { %1563 = vmatmul.mubr.bf16.vlgmr.msra.gmra.mxu0 %v527_v37  ;;  %1643 = vmatmul.mubr.bf16.vlgmr.msra.gmra.mxu1 %v1952_v48  ;;  %v411_v48 = vunpack.c.h.bf16 %v1992_v52  ;;  %v70_v37 = vld [vmem:[#allocation2 + $0xc0] sm:$0xff]  ;;  %v325_v49 = vmul.f32 %v1939_v9, %v255_v30  ;;  %v326_v50 = vmul.f32 %v1939_v9, %v256_v31  ;;  %v532_v51 = vpack.c.bf16 %v476_v36, %v475_v35  ;;  %v77_v31 = vld [vmem:[#allocation2 + $0xf8] sm:$0xff]  ;;  %v140_v33 = vld [vmem:[#allocation4 + $0xf8] sm:$0xff] }
  0x3d   :  { %1566 = vmatprep.mubr.bf16.mxu0 %v528_v43  ;;  %1646 = vmatprep.mubr.bf16.mxu1 %v1956_v56  ;;  %v529_v56 = vpack.c.bf16 %v470_v59, %v469_v57  ;;  %v323_v43 = vmul.f32 %v1939_v9, %v253_v26  ;;  %v416_v47 = vunpack.c.l.bf16 %v2012_v29  ;;  %v197_v54 = vsub.f32 %v71_v41, %v134_v42  ;;  %v72_v57 = vld [vmem:[#allocation2 + $0xd0] sm:$0xff]  ;;  %v79_v41 = vld [vmem:[#allocation2 + $0x108] sm:$0xff]  ;;  %v142_v42 = vld [vmem:[#allocation4 + $0x108] sm:$0xff] }
  0x3e   :  { %v474_v23 = vsub.f32 %v316_v39, %v411_v48  ;;  %v414_v39 = vunpack.c.l.bf16 %v2009_v24  ;;  %v478_v58 = vsub.f32 %v320_v8, %v415_v40  ;;  %v257_v60 = vmul.f32 %v194_v45, %v194_v45  ;;  %v74_v48 = vld [vmem:[#allocation2 + $0xe0] sm:$0xff] }
  0x3f   :  { %v2023_v59 = vpack.c.bf16 %v324_v44, %v323_v43  ;;  %v258_v61 = vmul.f32 %v195_v46, %v195_v46  ;;  %v479_v3 = vsub.f32 %v321_v10, %v416_v47  ;;  %v2026_v1 = vpack.c.bf16 %v326_v50, %v325_v49 }
  0x40   :  { %v531_v38 = vpack.c.bf16 %v474_v23, %v473_v22  ;;  %v477_v55 = vsub.f32 %v319_v2, %v414_v39  ;;  %v260_v7 = vmul.f32 %v197_v54, %v197_v54  ;;  %v198_v2 = vsub.f32 %v72_v57, %v135_v63  ;;  %v80_v63 = vld [vmem:[#allocation2 + $0x110] sm:$0xff] }
  0x41   :  { %v199_v8 = vsub.f32 %v73_v62, %v136_v0  ;;  %v328_v10 = vmul.f32 %v1939_v9, %v258_v61  ;;  %v419_v16 = vunpack.c.h.bf16 %v2023_v59  ;;  %v200_v21 = vsub.f32 %v74_v48, %v137_v12  ;;  %v81_v0 = vld [vmem:[#allocation2 + $0x118] sm:$0xff]  ;;  %v82_v48 = vld [vmem:[#allocation2 + $0x120] sm:$0xff]  ;;  %v83_v12 = vld [vmem:[#allocation2 + $0x128] sm:$0xff] }
  0x42   :  { %v533_v14 = vpack.c.bf16 %v478_v58, %v477_v55  ;;  %v330_v20 = vmul.f32 %v1939_v9, %v260_v7  ;;  %v201_v22 = vsub.f32 %v75_v11, %v138_v13  ;;  %v261_v23 = vmul.f32 %v198_v2, %v198_v2  ;;  %v144_v7 = vld [vmem:[#allocation4 + $0x118] sm:$0xff]  ;;  %v145_v13 = vld [vmem:[#allocation4 + $0x120] sm:$0xff] }
  0x43   :  { %v262_v26 = vmul.f32 %v199_v8, %v199_v8  ;;  %v482_v34 = vsub.f32 %v324_v44, %v419_v16  ;;  %v263_v39 = vmul.f32 %v200_v21, %v200_v21  ;;  %v202_v46 = vsub.f32 %v76_v27, %v139_v32 }
  0x44   :  { %1567 = vmatmul.mubr.bf16.gmra.mxu0 %v529_v56  ;;  %1647 = vmatmul.mubr.bf16.gmra.mxu1 %v1979_v19  ;;  %v133_v19 = vld [vmem:[#allocation4 + $0xc0] sm:$0xff]  ;;  %v418_v56 = vunpack.c.l.bf16 %v2023_v59  ;;  %v264_v40 = vmul.f32 %v201_v22, %v201_v22 }
  0x45   :  { %1570 = vmatprep.mubr.bf16.mxu0 %v530_v17  ;;  %1650 = vmatprep.mubr.bf16.mxu1 %v1982_v25  ;;  %v417_v25 = vunpack.c.h.bf16 %v2012_v29  ;;  %v196_v53 = vsub.f32 %v70_v37, %v133_v19  ;;  %v421_v17 = vunpack.c.h.bf16 %v2026_v1  ;;  %v78_v37 = vld [vmem:[#allocation2 + $0x100] sm:$0xff]  ;;  %v141_v19 = vld [vmem:[#allocation4 + $0x100] sm:$0xff]  ;;  %v332_v45 = vmul.f32 %v1939_v9, %v262_v26 }
  0x46   :  { %v481_v28 = vsub.f32 %v323_v43, %v418_v56  ;;  %v331_v43 = vmul.f32 %v1939_v9, %v261_v23  ;;  %v333_v54 = vmul.f32 %v1939_v9, %v263_v39  ;;  %v334_v55 = vmul.f32 %v1939_v9, %v264_v40  ;;  %v147_v39 = vld [vmem:[#allocation4 + $0x130] sm:$0xff]  ;;  %v148_v40 = vld [vmem:[#allocation4 + $0x138] sm:$0xff] }
  0x47   :  { %v480_v4 = vsub.f32 %v322_v15, %v417_v25  ;;  %v259_v6 = vmul.f32 %v196_v53, %v196_v53  ;;  %v484_v36 = vsub.f32 %v326_v50, %v421_v17  ;;  %v205_v50 = vsub.f32 %v79_v41, %v142_v42  ;;  %v86_v42 = vld [vmem:[#allocation2 + $0x140] sm:$0xff] }
  0x48   :  { %v535_v25 = vpack.c.bf16 %v482_v34, %v481_v28  ;;  %v2051_v57 = vpack.c.bf16 %v332_v45, %v331_v43  ;;  %v265_v58 = vmul.f32 %v202_v46, %v202_v46  ;;  %v2055_v11 = vpack.c.bf16 %v334_v55, %v333_v54 }
  0x49   :  { %v534_v15 = vpack.c.bf16 %v480_v4, %v479_v3  ;;  %v329_v18 = vmul.f32 %v1939_v9, %v259_v6  ;;  %v268_v4 = vmul.f32 %v205_v50, %v205_v50  ;;  %v143_v6 = vld [vmem:[#allocation4 + $0x110] sm:$0xff] }
  0x4a   :  { %v426_v56 = vunpack.c.l.bf16 %v2051_v57  ;;  %v206_v16 = vsub.f32 %v80_v63, %v143_v6  ;;  %v428_v22 = vunpack.c.l.bf16 %v2055_v11  ;;  %v429_v23 = vunpack.c.h.bf16 %v2055_v11 }
  0x4b   :  { %v338_v17 = vmul.f32 %v1939_v9, %v268_v4  ;;  %v151_v4 = vld [vmem:[#allocation4 + $0x150] sm:$0xff] }
  0x4c   :  { %1571 = vmatmul.mubr.bf16.gmra.mxu0 %v531_v38  ;;  %1651 = vmatmul.mubr.bf16.gmra.mxu1 %v1992_v52  ;;  %v327_v52 = vmul.f32 %v1939_v9, %v257_v60  ;;  %v2041_v38 = vpack.c.bf16 %v330_v20, %v329_v18  ;;  %v489_v26 = vsub.f32 %v331_v43, %v426_v56 }
  0x4d   :  { %1574 = vmatprep.mubr.bf16.mxu0 %v532_v51  ;;  %1654 = vmatprep.mubr.bf16.mxu1 %v1999_v5  ;;  %v420_v5 = vunpack.c.l.bf16 %v2026_v1  ;;  %v491_v41 = vsub.f32 %v333_v54, %v428_v22 }
  0x4e   :  { %v2037_v30 = vpack.c.bf16 %v328_v10, %v327_v52  ;;  %v424_v51 = vunpack.c.l.bf16 %v2041_v38  ;;  %v425_v53 = vunpack.c.h.bf16 %v2041_v38 }
  0x4f   :  { %v483_v35 = vsub.f32 %v325_v49, %v420_v5  ;;  %v207_v5 = vsub.f32 %v81_v0, %v144_v7 }
  0x50   :  { %v422_v44 = vunpack.c.l.bf16 %v2037_v30  ;;  %v423_v47 = vunpack.c.h.bf16 %v2037_v30  ;;  %v487_v2 = vsub.f32 %v329_v18, %v424_v51  ;;  %v488_v8 = vsub.f32 %v330_v20, %v425_v53 }
  0x51   :  { %v536_v49 = vpack.c.bf16 %v484_v36, %v483_v35  ;;  %v208_v18 = vsub.f32 %v82_v48, %v145_v13  ;;  %v270_v32 = vmul.f32 %v207_v5, %v207_v5 }
  0x52   :  { %v485_v61 = vsub.f32 %v327_v52, %v422_v44  ;;  %v486_v62 = vsub.f32 %v328_v10, %v423_v47  ;;  %v427_v52 = vunpack.c.h.bf16 %v2051_v57  ;;  %v538_v21 = vpack.c.bf16 %v488_v8, %v487_v2  ;;  %v150_v44 = vld [vmem:[#allocation4 + $0x148] sm:$0xff]  ;;  %v89_v2 = vld [vmem:[#allocation2 + $0x158] sm:$0xff]  ;;  %v152_v8 = vld [vmem:[#allocation4 + $0x158] sm:$0xff] }
  0x53   :  { %v271_v35 = vmul.f32 %v208_v18, %v208_v18 }
  0x54   :  { %1575 = vmatmul.mubr.bf16.gmra.mxu0 %v533_v14  ;;  %1655 = vmatmul.mubr.bf16.gmra.mxu1 %v2009_v24  ;;  %v203_v24 = vsub.f32 %v77_v31, %v140_v33  ;;  %v146_v14 = vld [vmem:[#allocation4 + $0x128] sm:$0xff]  ;;  %v490_v27 = vsub.f32 %v332_v45, %v427_v52  ;;  %v269_v31 = vmul.f32 %v206_v16, %v206_v16  ;;  %v84_v33 = vld [vmem:[#allocation2 + $0x130] sm:$0xff] }
  0x55   :  { %1578 = vmatprep.mubr.bf16.mxu0 %v534_v15  ;;  %1658 = vmatprep.mubr.bf16.mxu1 %v2012_v29  ;;  %v204_v29 = vsub.f32 %v78_v37, %v141_v19  ;;  %v537_v15 = vpack.c.bf16 %v486_v62, %v485_v61  ;;  %v209_v20 = vsub.f32 %v83_v12, %v146_v14  ;;  %v85_v37 = vld [vmem:[#allocation2 + $0x138] sm:$0xff]  ;;  %v90_v14 = vld [vmem:[#allocation2 + $0x160] sm:$0xff] }
  0x56   :  { %v266_v60 = vmul.f32 %v203_v24, %v203_v24  ;;  %v492_v19 = vsub.f32 %v334_v55, %v429_v23  ;;  %v539_v43 = vpack.c.bf16 %v490_v27, %v489_v26  ;;  %v87_v24 = vld [vmem:[#allocation2 + $0x148] sm:$0xff]  ;;  %v339_v47 = vmul.f32 %v1939_v9, %v269_v31  ;;  %v92_v27 = vld [vmem:[#allocation2 + $0x170] sm:$0xff] }
  0x57   :  { %v267_v3 = vmul.f32 %v204_v29, %v204_v29  ;;  %v272_v36 = vmul.f32 %v209_v20, %v209_v20  ;;  %v211_v29 = vsub.f32 %v85_v37, %v148_v40  ;;  %v341_v51 = vmul.f32 %v1939_v9, %v271_v35  ;;  %v155_v37 = vld [vmem:[#allocation4 + $0x170] sm:$0xff] }
  0x58   :  { %v336_v10 = vmul.f32 %v1939_v9, %v266_v60  ;;  %v540_v54 = vpack.c.bf16 %v492_v19, %v491_v41 }
  0x59   :  { %v342_v53 = vmul.f32 %v1939_v9, %v272_v36  ;;  %v274_v0 = vmul.f32 %v211_v29, %v211_v29  ;;  %v93_v36 = vld [vmem:[#allocation2 + $0x178] sm:$0xff] }
  0x5b   :  { %v2082_v48 = vpack.c.bf16 %v342_v53, %v341_v51  ;;  %v344_v5 = vmul.f32 %v1939_v9, %v274_v0  ;;  %v96_v0 = vld [vmem:[#allocation2 + $0x190] sm:$0xff] }
  0x5c   :  { %1579 = vmatmul.mubr.bf16.gmra.mxu0 %v535_v25  ;;  %1659 = vmatmul.mubr.bf16.gmra.mxu1 %v2023_v59  ;;  %v335_v59 = vmul.f32 %v1939_v9, %v265_v58  ;;  %v340_v25 = vmul.f32 %v1939_v9, %v270_v32  ;;  %v213_v58 = vsub.f32 %v87_v24, %v150_v44  ;;  %v95_v24 = vld [vmem:[#allocation2 + $0x188] sm:$0xff]  ;;  %v158_v44 = vld [vmem:[#allocation4 + $0x188] sm:$0xff] }
  0x5d   :  { %1582 = vmatprep.mubr.bf16.mxu0 %v536_v49  ;;  %1662 = vmatprep.mubr.bf16.mxu1 %v2026_v1  ;;  %v337_v1 = vmul.f32 %v1939_v9, %v267_v3  ;;  %v210_v49 = vsub.f32 %v84_v33, %v147_v39  ;;  %v88_v3 = vld [vmem:[#allocation2 + $0x150] sm:$0xff]  ;;  %v437_v20 = vunpack.c.h.bf16 %v2082_v48 }
  0x5e   :  { %v2065_v28 = vpack.c.bf16 %v336_v10, %v335_v59  ;;  %v2079_v62 = vpack.c.bf16 %v340_v25, %v339_v47  ;;  %v276_v13 = vmul.f32 %v213_v58, %v213_v58  ;;  %v214_v52 = vsub.f32 %v88_v3, %v151_v4  ;;  %v156_v39 = vld [vmem:[#allocation4 + $0x178] sm:$0xff] }
  0x5f   :  { %v2068_v34 = vpack.c.bf16 %v338_v17, %v337_v1  ;;  %v273_v63 = vmul.f32 %v210_v49, %v210_v49  ;;  %v500_v19 = vsub.f32 %v342_v53, %v437_v20  ;;  %v219_v49 = vsub.f32 %v93_v36, %v156_v39  ;;  %v100_v39 = vld [vmem:[#allocation2 + $0x1b0] sm:$0xff] }
  0x60   :  { %v430_v45 = vunpack.c.l.bf16 %v2065_v28  ;;  %v431_v46 = vunpack.c.h.bf16 %v2065_v28  ;;  %v434_v16 = vunpack.c.l.bf16 %v2079_v62  ;;  %v435_v18 = vunpack.c.h.bf16 %v2079_v62 }
  0x61   :  { %v432_v50 = vunpack.c.l.bf16 %v2068_v34  ;;  %v346_v22 = vmul.f32 %v1939_v9, %v276_v13  ;;  %v277_v33 = vmul.f32 %v214_v52, %v214_v52  ;;  %v221_v53 = vsub.f32 %v95_v24, %v158_v44  ;;  %v102_v44 = vld [vmem:[#allocation2 + $0x1c0] sm:$0xff] }
  0x62   :  { %v493_v60 = vsub.f32 %v335_v59, %v430_v45  ;;  %v494_v61 = vsub.f32 %v336_v10, %v431_v46  ;;  %v91_v59 = vld [vmem:[#allocation2 + $0x168] sm:$0xff]  ;;  %v153_v10 = vld [vmem:[#allocation4 + $0x160] sm:$0xff]  ;;  %v497_v31 = vsub.f32 %v339_v47, %v434_v16  ;;  %v498_v40 = vsub.f32 %v340_v25, %v435_v18  ;;  %v162_v16 = vld [vmem:[#allocation4 + $0x1a8] sm:$0xff] }
  0x63   :  { %v495_v6 = vsub.f32 %v337_v1, %v432_v50  ;;  %v215_v1 = vsub.f32 %v89_v2, %v152_v8  ;;  %v216_v23 = vsub.f32 %v90_v14, %v153_v10  ;;  %v218_v47 = vsub.f32 %v92_v27, %v155_v37  ;;  %v159_v2 = vld [vmem:[#allocation4 + $0x190] sm:$0xff]  ;;  %v160_v8 = vld [vmem:[#allocation4 + $0x198] sm:$0xff]  ;;  %v98_v14 = vld [vmem:[#allocation2 + $0x1a0] sm:$0xff] }
  0x64   :  { %1583 = vmatmul.mubr.bf16.gmra.mxu0 %v537_v15  ;;  %1663 = vmatmul.mubr.bf16.gmra.mxu1 %v2037_v30  ;;  %v149_v30 = vld [vmem:[#allocation4 + $0x140] sm:$0xff]  ;;  %v541_v56 = vpack.c.bf16 %v494_v61, %v493_v60  ;;  %v154_v15 = vld [vmem:[#allocation4 + $0x168] sm:$0xff]  ;;  %v347_v25 = vmul.f32 %v1939_v9, %v277_v33  ;;  %v284_v13 = vmul.f32 %v221_v53, %v221_v53  ;;  %v99_v10 = vld [vmem:[#allocation2 + $0x1a8] sm:$0xff] }
  0x65   :  { %1586 = vmatprep.mubr.bf16.mxu0 %v538_v21  ;;  %1666 = vmatprep.mubr.bf16.mxu1 %v2041_v38  ;;  %v433_v38 = vunpack.c.h.bf16 %v2068_v34  ;;  %v212_v55 = vsub.f32 %v86_v42, %v149_v30  ;;  %v217_v26 = vsub.f32 %v91_v59, %v154_v15  ;;  %v278_v35 = vmul.f32 %v215_v1, %v215_v1  ;;  %v94_v42 = vld [vmem:[#allocation2 + $0x180] sm:$0xff]  ;;  %v157_v30 = vld [vmem:[#allocation4 + $0x180] sm:$0xff] }
  0x66   :  { %v279_v45 = vmul.f32 %v216_v23, %v216_v23  ;;  %v281_v61 = vmul.f32 %v218_v47, %v218_v47  ;;  %v161_v15 = vld [vmem:[#allocation4 + $0x1a0] sm:$0xff]  ;;  %v222_v1 = vsub.f32 %v96_v0, %v159_v2  ;;  %v354_v20 = vmul.f32 %v1939_v9, %v284_v13  ;;  %v104_v13 = vld [vmem:[#allocation2 + $0x1d0] sm:$0xff] }
  0x67   :  { %v496_v7 = vsub.f32 %v338_v17, %v433_v38  ;;  %v275_v12 = vmul.f32 %v212_v55, %v212_v55  ;;  %v280_v46 = vmul.f32 %v217_v26, %v217_v26  ;;  %v348_v50 = vmul.f32 %v1939_v9, %v278_v35 }
  0x68   :  { %v543_v38 = vpack.c.bf16 %v498_v40, %v497_v31  ;;  %v349_v58 = vmul.f32 %v1939_v9, %v279_v45  ;;  %v285_v33 = vmul.f32 %v222_v1, %v222_v1  ;;  %v163_v45 = vld [vmem:[#allocation4 + $0x1b0] sm:$0xff]  ;;  %v169_v1 = vld [vmem:[#allocation4 + $0x1e0] sm:$0xff] }
  0x69   :  { %v542_v17 = vpack.c.bf16 %v496_v7, %v495_v6  ;;  %v345_v21 = vmul.f32 %v1939_v9, %v275_v12  ;;  %v350_v60 = vmul.f32 %v1939_v9, %v280_v46  ;;  %v2107_v6 = vpack.c.bf16 %v348_v50, %v347_v25  ;;  %v97_v7 = vld [vmem:[#allocation2 + $0x198] sm:$0xff]  ;;  %v164_v46 = vld [vmem:[#allocation4 + $0x1b8] sm:$0xff] }
  0x6b   :  { %v2111_v59 = vpack.c.bf16 %v350_v60, %v349_v58  ;;  %v442_v18 = vunpack.c.l.bf16 %v2107_v6 }
  0x6c   :  { %1587 = vmatmul.mubr.bf16.gmra.mxu0 %v539_v43  ;;  %1667 = vmatmul.mubr.bf16.gmra.mxu1 %v2051_v57  ;;  %v343_v57 = vmul.f32 %v1939_v9, %v273_v63  ;;  %v2097_v43 = vpack.c.bf16 %v346_v22, %v345_v21  ;;  %v282_v63 = vmul.f32 %v219_v49, %v219_v49 }
  0x6d   :  { %1590 = vmatprep.mubr.bf16.mxu0 %v540_v54  ;;  %1670 = vmatprep.mubr.bf16.mxu1 %v2055_v11  ;;  %v436_v11 = vunpack.c.l.bf16 %v2082_v48  ;;  %v444_v26 = vunpack.c.l.bf16 %v2111_v59  ;;  %v445_v27 = vunpack.c.h.bf16 %v2111_v59  ;;  %v505_v36 = vsub.f32 %v347_v25, %v442_v18  ;;  %v165_v25 = vld [vmem:[#allocation4 + $0x1c0] sm:$0xff] }
  0x6e   :  { %v2093_v32 = vpack.c.bf16 %v344_v5, %v343_v57  ;;  %v440_v54 = vunpack.c.l.bf16 %v2097_v43  ;;  %v441_v55 = vunpack.c.h.bf16 %v2097_v43 }
  0x6f   :  { %v499_v41 = vsub.f32 %v341_v51, %v436_v11  ;;  %v443_v11 = vunpack.c.h.bf16 %v2107_v6  ;;  %v507_v24 = vsub.f32 %v349_v58, %v444_v26 }
  0x70   :  { %v438_v29 = vunpack.c.l.bf16 %v2093_v32  ;;  %v504_v52 = vsub.f32 %v346_v22, %v441_v55  ;;  %v225_v22 = vsub.f32 %v99_v10, %v162_v16  ;;  %v168_v10 = vld [vmem:[#allocation4 + $0x1d8] sm:$0xff] }
  0x71   :  { %v544_v51 = vpack.c.bf16 %v500_v19, %v499_v41  ;;  %v506_v37 = vsub.f32 %v348_v50, %v443_v11  ;;  %v166_v50 = vld [vmem:[#allocation4 + $0x1c8] sm:$0xff] }
  0x72   :  { %v501_v3 = vsub.f32 %v343_v57, %v438_v29  ;;  %v351_v57 = vmul.f32 %v1939_v9, %v281_v61  ;;  %v288_v19 = vmul.f32 %v225_v22, %v225_v22  ;;  %v355_v29 = vmul.f32 %v1939_v9, %v285_v33 }
  0x74   :  { %1591 = vmatmul.mubr.bf16.gmra.mxu0 %v541_v56  ;;  %1671 = vmatmul.mubr.bf16.gmra.mxu1 %v2065_v28  ;;  %v439_v28 = vunpack.c.h.bf16 %v2093_v32  ;;  %v503_v56 = vsub.f32 %v345_v21, %v440_v54  ;;  %v224_v21 = vsub.f32 %v98_v14, %v161_v15  ;;  %v358_v55 = vmul.f32 %v1939_v9, %v288_v19  ;;  %v167_v14 = vld [vmem:[#allocation4 + $0x1d0] sm:$0xff]  ;;  %v106_v15 = vld [vmem:[#allocation2 + $0x1e0] sm:$0xff] }
  0x75   :  { %1594 = vmatprep.mubr.bf16.mxu0 %v542_v17  ;;  %1674 = vmatprep.mubr.bf16.mxu1 %v2068_v34  ;;  %v220_v34 = vsub.f32 %v94_v42, %v157_v30  ;;  %v223_v17 = vsub.f32 %v97_v7, %v160_v8  ;;  %v101_v42 = vld [vmem:[#allocation2 + $0x1b8] sm:$0xff]  ;;  %v508_v30 = vsub.f32 %v350_v60, %v445_v27 }
  0x76   :  { %v502_v4 = vsub.f32 %v344_v5, %v439_v28  ;;  %v352_v5 = vmul.f32 %v1939_v9, %v282_v63  ;;  %v546_v23 = vpack.c.bf16 %v504_v52, %v503_v56  ;;  %v287_v41 = vmul.f32 %v224_v21, %v224_v21  ;;  %v103_v28 = vld [vmem:[#allocation2 + $0x1c8] sm:$0xff]  ;;  %v105_v52 = vld [vmem:[#allocation2 + $0x1d8] sm:$0xff] }
  0x77   :  { %v283_v12 = vmul.f32 %v220_v34, %v220_v34  ;;  %v286_v35 = vmul.f32 %v223_v17, %v223_v17  ;;  %v227_v34 = vsub.f32 %v101_v42, %v164_v46  ;;  %v548_v58 = vpack.c.bf16 %v508_v30, %v507_v24  ;;  %v170_v17 = vld [vmem:[#allocation4 + $0x1e8] sm:$0xff]  ;;  %v108_v30 = vld [vmem:[#allocation2 + $0x1f0] sm:$0xff] }
  0x78   :  { %v2121_v31 = vpack.c.bf16 %v352_v5, %v351_v57  ;;  %v357_v54 = vmul.f32 %v1939_v9, %v287_v41  ;;  %v228_v60 = vsub.f32 %v102_v44, %v165_v25  ;;  %v229_v61 = vsub.f32 %v103_v28, %v166_v50  ;;  %v171_v44 = vld [vmem:[#allocation4 + $0x1f0] sm:$0xff] }
  0x79   :  { %v290_v7 = vmul.f32 %v227_v34, %v227_v34  ;;  %v231_v22 = vsub.f32 %v105_v52, %v168_v10  ;;  %v232_v27 = vsub.f32 %v106_v15, %v169_v1  ;;  %v234_v50 = vsub.f32 %v108_v30, %v171_v44 }
  0x7a   :  { %v446_v47 = vunpack.c.l.bf16 %v2121_v31  ;;  %v447_v49 = vunpack.c.h.bf16 %v2121_v31  ;;  %v292_v56 = vmul.f32 %v229_v61, %v229_v61 }
  0x7b   :  { %v294_v42 = vmul.f32 %v231_v22, %v231_v22  ;;  %v295_v46 = vmul.f32 %v232_v27, %v232_v27 }
  0x7c   :  { %1595 = vmatmul.mubr.bf16.gmra.mxu0 %v543_v38  ;;  %1675 = vmatmul.mubr.bf16.gmra.mxu1 %v2079_v62  ;;  %v545_v62 = vpack.c.bf16 %v502_v4, %v501_v3  ;;  %v547_v38 = vpack.c.bf16 %v506_v37, %v505_v36  ;;  %v509_v63 = vsub.f32 %v351_v57, %v446_v47 }
  0x7d   :  { %1598 = vmatprep.mubr.bf16.mxu0 %v544_v51  ;;  %1678 = vmatprep.mubr.bf16.mxu1 %v2082_v48  ;;  %v353_v48 = vmul.f32 %v1939_v9, %v283_v12  ;;  %v226_v51 = vsub.f32 %v100_v39, %v163_v45  ;;  %v510_v0 = vsub.f32 %v352_v5, %v447_v49  ;;  %v107_v5 = vld [vmem:[#allocation2 + $0x1e8] sm:$0xff] }
  0x7e   :  { %v394_v12 = vpack.c.bf16 %v358_v55, %v357_v54  ;;  %v233_v33 = vsub.f32 %v107_v5, %v170_v17 }
  0x7f   :  { %v2124_v40 = vpack.c.bf16 %v354_v20, %v353_v48  ;;  %v289_v4 = vmul.f32 %v226_v51, %v226_v51  ;;  %v549_v16 = vpack.c.bf16 %v510_v0, %v509_v63 }
  0x80   :  { %v453_v21 = vunpack.c.h.bf16 %v394_v12  ;;  %v296_v24 = vmul.f32 %v233_v33, %v233_v33 }
  0x81   :  { %v448_v53 = vunpack.c.l.bf16 %v2124_v40 }
  0x82   :  { %v516_v19 = vsub.f32 %v358_v55, %v453_v21 }
  0x83   :  { %v511_v2 = vsub.f32 %v353_v48, %v448_v53 }
  0x84   :  { %1599 = vmatmul.mubr.bf16.gmra.mxu0 %v545_v62  ;;  %1679 = vmatmul.mubr.bf16.gmra.mxu1 %v2093_v32  ;;  %v356_v32 = vmul.f32 %v1939_v9, %v286_v35  ;;  %v291_v9 = vmul.f32 %v228_v60, %v228_v60  ;;  %v1844_v62 = vld [vmem:[%s2401_s2] ss:$0 sm:$0xff] }
  0x85   :  { %1602 = vmatprep.mubr.bf16.mxu0 %v546_v23  ;;  %1682 = vmatprep.mubr.bf16.mxu1 %v2097_v43  ;;  %v449_v43 = vunpack.c.h.bf16 %v2124_v40  ;;  %v359_v18 = vmul.f32 %v1844_v62, %v289_v4  ;;  %v360_v11 = vmul.f32 %v1844_v62, %v290_v7  ;;  %v362_v26 = vmul.f32 %v1844_v62, %v292_v56 }
  0x86   :  { %v2135_v3 = vpack.c.bf16 %v356_v32, %v355_v29  ;;  %v361_v23 = vmul.f32 %v1844_v62, %v291_v9  ;;  %v364_v25 = vmul.f32 %v1844_v62, %v294_v42  ;;  %v365_v51 = vmul.f32 %v1844_v62, %v295_v46 }
  0x87   :  { %v512_v8 = vsub.f32 %v354_v20, %v449_v43  ;;  %v452_v20 = vunpack.c.l.bf16 %v394_v12  ;;  %v395_v37 = vpack.c.bf16 %v360_v11, %v359_v18  ;;  %v366_v34 = vmul.f32 %v1844_v62, %v296_v24 }
  0x88   :  { %v450_v57 = vunpack.c.l.bf16 %v2135_v3  ;;  %v396_v45 = vpack.c.bf16 %v362_v26, %v361_v23 }
  0x89   :  { %v550_v48 = vpack.c.bf16 %v512_v8, %v511_v2  ;;  %v515_v41 = vsub.f32 %v357_v54, %v452_v20  ;;  %v454_v49 = vunpack.c.l.bf16 %v395_v37  ;;  %v297_v54 = vmul.f32 %v234_v50, %v234_v50 }
  0x8a   :  { %v513_v35 = vsub.f32 %v355_v29, %v450_v57  ;;  %v455_v29 = vunpack.c.h.bf16 %v395_v37  ;;  %v398_v60 = vpack.c.bf16 %v366_v34, %v365_v51 }
  0x8b   :  { %v517_v53 = vsub.f32 %v359_v18, %v454_v49  ;;  %v367_v4 = vmul.f32 %v1844_v62, %v297_v54 }
  0x8c   :  { %1603 = vmatmul.mubr.bf16.gmra.mxu0 %v547_v38  ;;  %1683 = vmatmul.mubr.bf16.gmra.mxu1 %v2107_v6  ;;  %v451_v6 = vunpack.c.h.bf16 %v2135_v3  ;;  %v456_v38 = vunpack.c.l.bf16 %v396_v45  ;;  %v460_v2 = vunpack.c.l.bf16 %v398_v60  ;;  %v461_v8 = vunpack.c.h.bf16 %v398_v60 }
  0x8d   :  { %1606 = vmatprep.mubr.bf16.mxu0 %v548_v58  ;;  %1686 = vmatprep.mubr.bf16.mxu1 %v2111_v59  ;;  %v230_v59 = vsub.f32 %v104_v13, %v167_v14 }
  0x8e   :  { %v514_v36 = vsub.f32 %v356_v32, %v451_v6  ;;  %v552_v32 = vpack.c.bf16 %v516_v19, %v515_v41  ;;  %v519_v55 = vsub.f32 %v361_v23, %v456_v38  ;;  %v523_v9 = vsub.f32 %v365_v51, %v460_v2 }
  0x8f   :  { %v293_v39 = vmul.f32 %v230_v59, %v230_v59  ;;  %v524_v56 = vsub.f32 %v366_v34, %v461_v8 }
  0x90   :  { %v551_v47 = vpack.c.bf16 %v514_v36, %v513_v35 }
  0x91   :  { %v363_v28 = vmul.f32 %v1844_v62, %v293_v39  ;;  %v556_v10 = vpack.c.bf16 %v524_v56, %v523_v9 }
  0x93   :  { %v397_v43 = vpack.c.bf16 %v364_v25, %v363_v28 }
  0x94   :  { %1607 = vmatmul.mubr.bf16.gmra.mxu0 %v549_v16  ;;  %1687 = vmatmul.mubr.bf16.gmra.mxu1 %v2121_v31  ;;  %v457_v31 = vunpack.c.h.bf16 %v396_v45 }
  0x95   :  { %1610 = vmatprep.mubr.bf16.mxu0 %v550_v48  ;;  %1690 = vmatprep.mubr.bf16.mxu1 %v2124_v40  ;;  %v518_v40 = vsub.f32 %v360_v11, %v455_v29  ;;  %v458_v63 = vunpack.c.l.bf16 %v397_v43  ;;  %v459_v0 = vunpack.c.h.bf16 %v397_v43 }
  0x96   :  { %v520_v58 = vsub.f32 %v362_v26, %v457_v31 }
  0x97   :  { %v553_v61 = vpack.c.bf16 %v518_v40, %v517_v53  ;;  %v521_v13 = vsub.f32 %v363_v28, %v458_v63  ;;  %v522_v14 = vsub.f32 %v364_v25, %v459_v0 }
  0x98   :  { %v554_v7 = vpack.c.bf16 %v520_v58, %v519_v55 }
  0x9c   :  { %1611 = vmatmul.mubr.bf16.gmra.mxu0 %v551_v47  ;;  %1691 = vmatmul.mubr.bf16.gmra.mxu1 %v2135_v3  ;;  %v399_v3 = vpack.c.bf16 %v367_v4, %v367_v4 }
  0x9d   :  { %1614 = vmatprep.mubr.bf16.mxu0 %v552_v32  ;;  %1694 = vmatprep.mubr.bf16.mxu1 %v394_v12  ;;  %v555_v12 = vpack.c.bf16 %v522_v14, %v521_v13 }
  0x9e   :  { %v462_v52 = vunpack.c.l.bf16 %v399_v3 }
  0xa0   :  { %v525_v15 = vsub.f32 %v367_v4, %v462_v52 }
  0xa2   :  { %v557_v16 = vpack.c.bf16 %v525_v15, %v525_v15 }
  0xa4   :  { %1615 = vmatmul.mubr.bf16.gmra.mxu0 %v553_v61  ;;  %1695 = vmatmul.mubr.bf16.gmra.mxu1 %v395_v37 }
  0xa5   :  { %1618 = vmatprep.mubr.bf16.mxu0 %v554_v7  ;;  %1698 = vmatprep.mubr.bf16.mxu1 %v396_v45 }
  0xac   :  { %1619 = vmatmul.mubr.bf16.gmra.mxu0 %v555_v12  ;;  %1699 = vmatmul.mubr.bf16.gmra.mxu1 %v397_v43 }
  0xad   :  { %1622 = vmatprep.mubr.bf16.mxu0 %v556_v10  ;;  %1702 = vmatprep.mubr.bf16.mxu1 %v398_v60 }
  0xb4   :  { %1623 = vmatmul.mubr.bf16.gmra.mxu0 %v557_v16  ;;  %1703 = vmatmul.mubr.bf16.gmra.mxu1 %v399_v3 }
  0xfc   :  { %v1564_v57 = vpop.f32.mrf.mxu0  ;;  %v1644_v5 = vpop.f32.mrf.mxu1 }
  0xfd   :  { %v953_v1 = vadd.f32 %v1644_v5, %v1564_v57 }
  0xfe   :  { %v656_v17 = vpop.f32.mrf.mxu0  ;;  %v944_v6 = vpop.f32.mrf.mxu1 }
  0xff   :  { %v1200_v62 = vmul.f32 -0.1, %v953_v1  ;;  %v945_v18 = vadd.f32 %v944_v6, %v656_v17 }
 0x100   :  { %v1565_v11 = vpop.f32.mrf.mxu0  ;;  %v1645_v59 = vpop.f32.mrf.mxu1 }
 0x101   :  { %v1265_v48 = vmul.f32 1.442695, %v1200_v62  ;;  %v1198_v20 = vmul.f32 -0.1, %v945_v18  ;;  %v956_v21 = vadd.f32 %v1645_v59, %v1565_v11 }
 0x102   :  { %v659_v22 = vpop.f32.mrf.mxu0  ;;  %v947_v23 = vpop.f32.mrf.mxu1 }
 0x103   :  { %1718 = vpow2.f32 %v1265_v48  ;;  %v1261_v26 = vmul.f32 1.442695, %v1198_v20  ;;  %v1201_v27 = vmul.f32 -0.1, %v956_v21  ;;  %v948_v33 = vadd.f32 %v947_v23, %v659_v22 }
 0x104   :  { %v1568_v35 = vpop.f32.mrf.mxu0  ;;  %v1648_v36 = vpop.f32.mrf.mxu1 }
 0x105   :  { %1720 = vpow2.f32 %v1261_v26  ;;  %v1267_v37 = vmul.f32 1.442695, %v1201_v27  ;;  %v1199_v39 = vmul.f32 -0.1, %v948_v33  ;;  %v969_v41 = vadd.f32 %v1648_v36, %v1568_v35 }
 0x106   :  { %v672_v19 = vpop.f32.mrf.mxu0  ;;  %v960_v42 = vpop.f32.mrf.mxu1 }
 0x107   :  { %1722 = vpow2.f32 %v1267_v37  ;;  %v1263_v45 = vmul.f32 1.442695, %v1199_v39  ;;  %v1204_v46 = vmul.f32 -0.1, %v969_v41  ;;  %v961_v24 = vadd.f32 %v960_v42, %v672_v19 }
 0x108   :  { %v1569_v30 = vpop.f32.mrf.mxu0  ;;  %v1649_v44 = vpop.f32.mrf.mxu1 }
 0x109   :  { %1724 = vpow2.f32 %v1263_v45  ;;  %v1273_v47 = vmul.f32 1.442695, %v1204_v46  ;;  %v1202_v49 = vmul.f32 -0.1, %v961_v24  ;;  %v972_v29 = vadd.f32 %v1649_v44, %v1569_v30 }
 0x10a   :  { %v675_v32 = vpop.f32.mrf.mxu0  ;;  %v963_v28 = vpop.f32.mrf.mxu1 }
 0x10b   :  { %1726 = vpow2.f32 %v1273_v47  ;;  %v1269_v25 = vmul.f32 1.442695, %v1202_v49  ;;  %v1205_v50 = vmul.f32 -0.1, %v972_v29  ;;  %v964_v38 = vadd.f32 %v963_v28, %v675_v32 }
 0x10c   :  { %v1572_v31 = vpop.f32.mrf.mxu0  ;;  %v1652_v51 = vpop.f32.mrf.mxu1 }
 0x10d   :  { %1728 = vpow2.f32 %v1269_v25  ;;  %v1275_v34 = vmul.f32 1.442695, %v1205_v50  ;;  %v1203_v53 = vmul.f32 -0.1, %v964_v38  ;;  %v985_v40 = vadd.f32 %v1652_v51, %v1572_v31 }
 0x10e   :  { %v688_v43 = vpop.f32.mrf.mxu0  ;;  %v976_v54 = vpop.f32.mrf.mxu1 }
 0x10f   :  { %1730 = vpow2.f32 %v1275_v34  ;;  %v1271_v55 = vmul.f32 1.442695, %v1203_v53  ;;  %v1208_v58 = vmul.f32 -0.1, %v985_v40  ;;  %v977_v60 = vadd.f32 %v976_v54, %v688_v43 }
 0x110   :  { %v1719_v61 = vpop.eup %1718  ;;  %v1573_v63 = vpop.f32.mrf.mxu0 }
 0x111   :  { %v1653_v0 = vpop.f32.mrf.mxu1  ;;  %1390 = vst.msk [vmem:[%s2403_s4 + $0x10] sm:$0xff] %vm1387_vm0, %v1719_v61  ;;  %1732 = vpow2.f32 %v1271_v55  ;;  %v1281_v4 = vmul.f32 1.442695, %v1208_v58  ;;  %v1206_v7 = vmul.f32 -0.1, %v977_v60 }
 0x112   :  { %v988_v2 = vadd.f32 %v1653_v0, %v1573_v63  ;;  %v1721_v8 = vpop.eup %1720  ;;  %v691_v13 = vpop.f32.mrf.mxu0 }
 0x113   :  { %v979_v14 = vpop.f32.mrf.mxu1  ;;  %1388 = vst.msk [vmem:[%s2403_s4] sm:$0xff] %vm1387_vm0, %v1721_v8  ;;  %1734 = vpow2.f32 %v1281_v4  ;;  %v1277_v3 = vmul.f32 1.442695, %v1206_v7 }
 0x114   :  { %v1209_v9 = vmul.f32 -0.1, %v988_v2  ;;  %v980_v56 = vadd.f32 %v979_v14, %v691_v13  ;;  %v1723_v12 = vpop.eup %1722  ;;  %v1576_v52 = vpop.f32.mrf.mxu0 }
 0x115   :  { %v1656_v10 = vpop.f32.mrf.mxu1  ;;  %1391 = vst.msk [vmem:[%s2403_s4 + $0x18] sm:$0xff] %vm1387_vm0, %v1723_v12  ;;  %1736 = vpow2.f32 %v1277_v3 }
 0x116   :  { %v1283_v15 = vmul.f32 1.442695, %v1209_v9  ;;  %v1207_v16 = vmul.f32 -0.1, %v980_v56  ;;  %v1001_v57 = vadd.f32 %v1656_v10, %v1576_v52  ;;  %v1725_v5 = vpop.eup %1724  ;;  %v704_v1 = vpop.f32.mrf.mxu0 }
 0x117   :  { %v992_v17 = vpop.f32.mrf.mxu1  ;;  %1389 = vst.msk [vmem:[%s2403_s4 + $0x8] sm:$0xff] %vm1387_vm0, %v1725_v5 }
 0x118   :  { %1738 = vpow2.f32 %v1283_v15  ;;  %v1279_v6 = vmul.f32 1.442695, %v1207_v16  ;;  %v1212_v62 = vmul.f32 -0.1, %v1001_v57  ;;  %v993_v18 = vadd.f32 %v992_v17, %v704_v1  ;;  %v1727_v11 = vpop.eup %1726  ;;  %v1577_v59 = vpop.f32.mrf.mxu0 }
 0x119   :  { %v1657_v48 = vpop.f32.mrf.mxu1  ;;  %1394 = vst.msk [vmem:[%s2403_s4 + $0x30] sm:$0xff] %vm1387_vm0, %v1727_v11 }
 0x11a   :  { %1740 = vpow2.f32 %v1279_v6  ;;  %v1289_v20 = vmul.f32 1.442695, %v1212_v62  ;;  %v1210_v21 = vmul.f32 -0.1, %v993_v18  ;;  %v1004_v22 = vadd.f32 %v1657_v48, %v1577_v59  ;;  %v1729_v23 = vpop.eup %1728  ;;  %v707_v26 = vpop.f32.mrf.mxu0 }
 0x11b   :  { %v995_v27 = vpop.f32.mrf.mxu1  ;;  %1392 = vst.msk [vmem:[%s2403_s4 + $0x20] sm:$0xff] %vm1387_vm0, %v1729_v23 }
 0x11c   :  { %1742 = vpow2.f32 %v1289_v20  ;;  %v1285_v33 = vmul.f32 1.442695, %v1210_v21  ;;  %v1213_v35 = vmul.f32 -0.1, %v1004_v22  ;;  %v996_v36 = vadd.f32 %v995_v27, %v707_v26  ;;  %v1731_v37 = vpop.eup %1730  ;;  %v1580_v39 = vpop.f32.mrf.mxu0 }
 0x11d   :  { %v1660_v41 = vpop.f32.mrf.mxu1  ;;  %1395 = vst.msk [vmem:[%s2403_s4 + $0x38] sm:$0xff] %vm1387_vm0, %v1731_v37 }
 0x11e   :  { %1744 = vpow2.f32 %v1285_v33  ;;  %v1291_v19 = vmul.f32 1.442695, %v1213_v35  ;;  %v1211_v42 = vmul.f32 -0.1, %v996_v36  ;;  %v1017_v45 = vadd.f32 %v1660_v41, %v1580_v39  ;;  %v1733_v46 = vpop.eup %1732  ;;  %v720_v24 = vpop.f32.mrf.mxu0 }
 0x11f   :  { %v1008_v30 = vpop.f32.mrf.mxu1  ;;  %1393 = vst.msk [vmem:[%s2403_s4 + $0x28] sm:$0xff] %vm1387_vm0, %v1733_v46 }
 0x120   :  { %1746 = vpow2.f32 %v1291_v19  ;;  %v1287_v44 = vmul.f32 1.442695, %v1211_v42  ;;  %v1216_v47 = vmul.f32 -0.1, %v1017_v45  ;;  %v1009_v49 = vadd.f32 %v1008_v30, %v720_v24  ;;  %v1735_v29 = vpop.eup %1734  ;;  %v1581_v32 = vpop.f32.mrf.mxu0 }
 0x121   :  { %v1661_v28 = vpop.f32.mrf.mxu1  ;;  %1398 = vst.msk [vmem:[%s2403_s4 + $0x50] sm:$0xff] %vm1387_vm0, %v1735_v29 }
 0x122   :  { %1748 = vpow2.f32 %v1287_v44  ;;  %v1297_v25 = vmul.f32 1.442695, %v1216_v47  ;;  %v1214_v50 = vmul.f32 -0.1, %v1009_v49  ;;  %v1020_v38 = vadd.f32 %v1661_v28, %v1581_v32  ;;  %v1737_v31 = vpop.eup %1736  ;;  %v723_v51 = vpop.f32.mrf.mxu0 }
 0x123   :  { %v1011_v34 = vpop.f32.mrf.mxu1  ;;  %1396 = vst.msk [vmem:[%s2403_s4 + $0x40] sm:$0xff] %vm1387_vm0, %v1737_v31 }
 0x124   :  { %1750 = vpow2.f32 %v1297_v25  ;;  %v1293_v53 = vmul.f32 1.442695, %v1214_v50  ;;  %v1217_v40 = vmul.f32 -0.1, %v1020_v38  ;;  %v1012_v43 = vadd.f32 %v1011_v34, %v723_v51  ;;  %v1584_v55 = vpop.f32.mrf.mxu0 }
 0x125   :  { %v1739_v54 = vpop.eup %1738  ;;  %v1664_v58 = vpop.f32.mrf.mxu1 }
 0x126   :  { %1399 = vst.msk [vmem:[%s2403_s4 + $0x58] sm:$0xff] %vm1387_vm0, %v1739_v54  ;;  %1752 = vpow2.f32 %v1293_v53  ;;  %v1299_v60 = vmul.f32 1.442695, %v1217_v40  ;;  %v1215_v61 = vmul.f32 -0.1, %v1012_v43  ;;  %v1033_v63 = vadd.f32 %v1664_v58, %v1584_v55  ;;  %v736_v4 = vpop.f32.mrf.mxu0 }
 0x127   :  { %v1741_v0 = vpop.eup %1740  ;;  %v1024_v7 = vpop.f32.mrf.mxu1 }
 0x128   :  { %1397 = vst.msk [vmem:[%s2403_s4 + $0x48] sm:$0xff] %vm1387_vm0, %v1741_v0  ;;  %1754 = vpow2.f32 %v1299_v60  ;;  %v1295_v2 = vmul.f32 1.442695, %v1215_v61  ;;  %v1220_v8 = vmul.f32 -0.1, %v1033_v63  ;;  %v1025_v13 = vadd.f32 %v1024_v7, %v736_v4  ;;  %v1585_v3 = vpop.f32.mrf.mxu0 }
 0x129   :  { %v1743_v14 = vpop.eup %1742  ;;  %v1665_v9 = vpop.f32.mrf.mxu1 }
 0x12a   :  { %1402 = vst.msk [vmem:[%s2403_s4 + $0x70] sm:$0xff] %vm1387_vm0, %v1743_v14  ;;  %1756 = vpow2.f32 %v1295_v2  ;;  %v1305_v56 = vmul.f32 1.442695, %v1220_v8  ;;  %v1218_v12 = vmul.f32 -0.1, %v1025_v13  ;;  %v1036_v52 = vadd.f32 %v1665_v9, %v1585_v3  ;;  %v739_v15 = vpop.f32.mrf.mxu0 }
 0x12b   :  { %v1745_v10 = vpop.eup %1744  ;;  %v1027_v16 = vpop.f32.mrf.mxu1 }
 0x12c   :  { %1400 = vst.msk [vmem:[%s2403_s4 + $0x60] sm:$0xff] %vm1387_vm0, %v1745_v10  ;;  %1758 = vpow2.f32 %v1305_v56  ;;  %v1301_v57 = vmul.f32 1.442695, %v1218_v12  ;;  %v1221_v5 = vmul.f32 -0.1, %v1036_v52  ;;  %v1028_v1 = vadd.f32 %v1027_v16, %v739_v15  ;;  %v1588_v6 = vpop.f32.mrf.mxu0 }
 0x12d   :  { %v1747_v17 = vpop.eup %1746  ;;  %v1668_v62 = vpop.f32.mrf.mxu1 }
 0x12e   :  { %1403 = vst.msk [vmem:[%s2403_s4 + $0x78] sm:$0xff] %vm1387_vm0, %v1747_v17  ;;  %1760 = vpow2.f32 %v1301_v57  ;;  %v1307_v18 = vmul.f32 1.442695, %v1221_v5  ;;  %v1219_v11 = vmul.f32 -0.1, %v1028_v1  ;;  %v1049_v59 = vadd.f32 %v1668_v62, %v1588_v6  ;;  %v752_v20 = vpop.f32.mrf.mxu0 }
 0x12f   :  { %v1749_v48 = vpop.eup %1748  ;;  %v1040_v21 = vpop.f32.mrf.mxu1 }
 0x130   :  { %1401 = vst.msk [vmem:[%s2403_s4 + $0x68] sm:$0xff] %vm1387_vm0, %v1749_v48  ;;  %1762 = vpow2.f32 %v1307_v18  ;;  %v1303_v22 = vmul.f32 1.442695, %v1219_v11  ;;  %v1224_v23 = vmul.f32 -0.1, %v1049_v59  ;;  %v1041_v26 = vadd.f32 %v1040_v21, %v752_v20  ;;  %v1589_v33 = vpop.f32.mrf.mxu0 }
 0x131   :  { %v1751_v27 = vpop.eup %1750  ;;  %v1669_v35 = vpop.f32.mrf.mxu1 }
 0x132   :  { %1406 = vst.msk [vmem:[%s2403_s4 + $0x90] sm:$0xff] %vm1387_vm0, %v1751_v27  ;;  %1764 = vpow2.f32 %v1303_v22  ;;  %v1313_v36 = vmul.f32 1.442695, %v1224_v23  ;;  %v1222_v37 = vmul.f32 -0.1, %v1041_v26  ;;  %v1052_v39 = vadd.f32 %v1669_v35, %v1589_v33  ;;  %v755_v19 = vpop.f32.mrf.mxu0 }
 0x133   :  { %v1753_v41 = vpop.eup %1752  ;;  %v1043_v42 = vpop.f32.mrf.mxu1 }
 0x134   :  { %1404 = vst.msk [vmem:[%s2403_s4 + $0x80] sm:$0xff] %vm1387_vm0, %v1753_v41  ;;  %1766 = vpow2.f32 %v1313_v36  ;;  %v1309_v45 = vmul.f32 1.442695, %v1222_v37  ;;  %v1225_v46 = vmul.f32 -0.1, %v1052_v39  ;;  %v1044_v24 = vadd.f32 %v1043_v42, %v755_v19  ;;  %v1592_v44 = vpop.f32.mrf.mxu0 }
 0x135   :  { %v1755_v30 = vpop.eup %1754  ;;  %v1672_v47 = vpop.f32.mrf.mxu1 }
 0x136   :  { %1407 = vst.msk [vmem:[%s2403_s4 + $0x98] sm:$0xff] %vm1387_vm0, %v1755_v30  ;;  %1768 = vpow2.f32 %v1309_v45  ;;  %v1315_v49 = vmul.f32 1.442695, %v1225_v46  ;;  %v1223_v29 = vmul.f32 -0.1, %v1044_v24  ;;  %v1065_v32 = vadd.f32 %v1672_v47, %v1592_v44  ;;  %v768_v25 = vpop.f32.mrf.mxu0 }
 0x137   :  { %v1757_v28 = vpop.eup %1756  ;;  %v1056_v50 = vpop.f32.mrf.mxu1 }
 0x138   :  { %1405 = vst.msk [vmem:[%s2403_s4 + $0x88] sm:$0xff] %vm1387_vm0, %v1757_v28  ;;  %1770 = vpow2.f32 %v1315_v49  ;;  %v1311_v38 = vmul.f32 1.442695, %v1223_v29  ;;  %v1228_v31 = vmul.f32 -0.1, %v1065_v32  ;;  %v1057_v51 = vadd.f32 %v1056_v50, %v768_v25  ;;  %v1593_v53 = vpop.f32.mrf.mxu0 }
 0x139   :  { %v1759_v34 = vpop.eup %1758  ;;  %v1673_v40 = vpop.f32.mrf.mxu1 }
 0x13a   :  { %1410 = vst.msk [vmem:[%s2403_s4 + $0xb0] sm:$0xff] %vm1387_vm0, %v1759_v34  ;;  %1772 = vpow2.f32 %v1311_v38  ;;  %v1321_v43 = vmul.f32 1.442695, %v1228_v31  ;;  %v1226_v54 = vmul.f32 -0.1, %v1057_v51  ;;  %v1068_v55 = vadd.f32 %v1673_v40, %v1593_v53  ;;  %v771_v60 = vpop.f32.mrf.mxu0 }
 0x13b   :  { %v1761_v58 = vpop.eup %1760  ;;  %v1059_v61 = vpop.f32.mrf.mxu1 }
 0x13c   :  { %1408 = vst.msk [vmem:[%s2403_s4 + $0xa0] sm:$0xff] %vm1387_vm0, %v1761_v58  ;;  %1774 = vpow2.f32 %v1321_v43  ;;  %v1317_v63 = vmul.f32 1.442695, %v1226_v54  ;;  %v1229_v0 = vmul.f32 -0.1, %v1068_v55  ;;  %v1060_v4 = vadd.f32 %v1059_v61, %v771_v60  ;;  %v1596_v2 = vpop.f32.mrf.mxu0 }
 0x13d   :  { %v1763_v7 = vpop.eup %1762  ;;  %v1676_v8 = vpop.f32.mrf.mxu1 }
 0x13e   :  { %1411 = vst.msk [vmem:[%s2403_s4 + $0xb8] sm:$0xff] %vm1387_vm0, %v1763_v7  ;;  %1776 = vpow2.f32 %v1317_v63  ;;  %v1323_v13 = vmul.f32 1.442695, %v1229_v0  ;;  %v1227_v14 = vmul.f32 -0.1, %v1060_v4  ;;  %v1081_v3 = vadd.f32 %v1676_v8, %v1596_v2  ;;  %v784_v56 = vpop.f32.mrf.mxu0 }
 0x13f   :  { %v1765_v9 = vpop.eup %1764  ;;  %v1072_v12 = vpop.f32.mrf.mxu1 }
 0x140   :  { %1409 = vst.msk [vmem:[%s2403_s4 + $0xa8] sm:$0xff] %vm1387_vm0, %v1765_v9  ;;  %1778 = vpow2.f32 %v1323_v13  ;;  %v1319_v52 = vmul.f32 1.442695, %v1227_v14  ;;  %v1232_v10 = vmul.f32 -0.1, %v1081_v3  ;;  %v1073_v15 = vadd.f32 %v1072_v12, %v784_v56  ;;  %v1597_v57 = vpop.f32.mrf.mxu0 }
 0x141   :  { %v1767_v16 = vpop.eup %1766  ;;  %v1677_v5 = vpop.f32.mrf.mxu1 }
 0x142   :  { %1414 = vst.msk [vmem:[%s2403_s4 + $0xd0] sm:$0xff] %vm1387_vm0, %v1767_v16  ;;  %1780 = vpow2.f32 %v1319_v52  ;;  %v1329_v1 = vmul.f32 1.442695, %v1232_v10  ;;  %v1230_v17 = vmul.f32 -0.1, %v1073_v15  ;;  %v1084_v6 = vadd.f32 %v1677_v5, %v1597_v57  ;;  %v787_v18 = vpop.f32.mrf.mxu0 }
 0x143   :  { %v1769_v62 = vpop.eup %1768  ;;  %v1075_v11 = vpop.f32.mrf.mxu1 }
 0x144   :  { %1412 = vst.msk [vmem:[%s2403_s4 + $0xc0] sm:$0xff] %vm1387_vm0, %v1769_v62  ;;  %1782 = vpow2.f32 %v1329_v1  ;;  %v1325_v59 = vmul.f32 1.442695, %v1230_v17  ;;  %v1233_v48 = vmul.f32 -0.1, %v1084_v6  ;;  %v1076_v20 = vadd.f32 %v1075_v11, %v787_v18  ;;  %v1600_v22 = vpop.f32.mrf.mxu0 }
 0x145   :  { %v1771_v21 = vpop.eup %1770  ;;  %v1680_v23 = vpop.f32.mrf.mxu1 }
 0x146   :  { %1415 = vst.msk [vmem:[%s2403_s4 + $0xd8] sm:$0xff] %vm1387_vm0, %v1771_v21  ;;  %1784 = vpow2.f32 %v1325_v59  ;;  %v1331_v26 = vmul.f32 1.442695, %v1233_v48  ;;  %v1231_v27 = vmul.f32 -0.1, %v1076_v20  ;;  %v1097_v33 = vadd.f32 %v1680_v23, %v1600_v22  ;;  %v800_v36 = vpop.f32.mrf.mxu0 }
 0x147   :  { %v1773_v35 = vpop.eup %1772  ;;  %v1088_v37 = vpop.f32.mrf.mxu1 }
 0x148   :  { %1413 = vst.msk [vmem:[%s2403_s4 + $0xc8] sm:$0xff] %vm1387_vm0, %v1773_v35  ;;  %1786 = vpow2.f32 %v1331_v26  ;;  %v1327_v39 = vmul.f32 1.442695, %v1231_v27  ;;  %v1236_v41 = vmul.f32 -0.1, %v1097_v33  ;;  %v1089_v19 = vadd.f32 %v1088_v37, %v800_v36  ;;  %v1601_v45 = vpop.f32.mrf.mxu0 }
 0x149   :  { %v1775_v42 = vpop.eup %1774  ;;  %v1681_v46 = vpop.f32.mrf.mxu1 }
 0x14a   :  { %1418 = vst.msk [vmem:[%s2403_s4 + $0xf0] sm:$0xff] %vm1387_vm0, %v1775_v42  ;;  %1788 = vpow2.f32 %v1327_v39  ;;  %v1337_v24 = vmul.f32 1.442695, %v1236_v41  ;;  %v1234_v30 = vmul.f32 -0.1, %v1089_v19  ;;  %v1100_v44 = vadd.f32 %v1681_v46, %v1601_v45  ;;  %v803_v49 = vpop.f32.mrf.mxu0 }
 0x14b   :  { %v1777_v47 = vpop.eup %1776  ;;  %v1091_v29 = vpop.f32.mrf.mxu1 }
 0x14c   :  { %1416 = vst.msk [vmem:[%s2403_s4 + $0xe0] sm:$0xff] %vm1387_vm0, %v1777_v47  ;;  %1790 = vpow2.f32 %v1337_v24  ;;  %v1333_v32 = vmul.f32 1.442695, %v1234_v30  ;;  %v1237_v28 = vmul.f32 -0.1, %v1100_v44  ;;  %v1092_v25 = vadd.f32 %v1091_v29, %v803_v49  ;;  %v1604_v38 = vpop.f32.mrf.mxu0 }
 0x14d   :  { %v1779_v50 = vpop.eup %1778  ;;  %v1684_v31 = vpop.f32.mrf.mxu1 }
 0x14e   :  { %1419 = vst.msk [vmem:[%s2403_s4 + $0xf8] sm:$0xff] %vm1387_vm0, %v1779_v50  ;;  %1792 = vpow2.f32 %v1333_v32  ;;  %v1339_v51 = vmul.f32 1.442695, %v1237_v28  ;;  %v1235_v34 = vmul.f32 -0.1, %v1092_v25  ;;  %v1113_v53 = vadd.f32 %v1684_v31, %v1604_v38  ;;  %v816_v43 = vpop.f32.mrf.mxu0 }
 0x14f   :  { %v1781_v40 = vpop.eup %1780  ;;  %v1104_v54 = vpop.f32.mrf.mxu1 }
 0x150   :  { %1417 = vst.msk [vmem:[%s2403_s4 + $0xe8] sm:$0xff] %vm1387_vm0, %v1781_v40  ;;  %1794 = vpow2.f32 %v1339_v51  ;;  %v1335_v55 = vmul.f32 1.442695, %v1235_v34  ;;  %v1240_v58 = vmul.f32 -0.1, %v1113_v53  ;;  %v1105_v60 = vadd.f32 %v1104_v54, %v816_v43  ;;  %v1605_v63 = vpop.f32.mrf.mxu0 }
 0x151   :  { %v1783_v61 = vpop.eup %1782  ;;  %v1685_v0 = vpop.f32.mrf.mxu1 }
 0x152   :  { %1422 = vst.msk [vmem:[%s2403_s4 + $0x110] sm:$0xff] %vm1387_vm0, %v1783_v61  ;;  %1796 = vpow2.f32 %v1335_v55  ;;  %v1345_v4 = vmul.f32 1.442695, %v1240_v58  ;;  %v1238_v7 = vmul.f32 -0.1, %v1105_v60  ;;  %v1116_v2 = vadd.f32 %v1685_v0, %v1605_v63  ;;  %v819_v13 = vpop.f32.mrf.mxu0 }
 0x153   :  { %v1785_v8 = vpop.eup %1784  ;;  %v1107_v14 = vpop.f32.mrf.mxu1 }
 0x154   :  { %1420 = vst.msk [vmem:[%s2403_s4 + $0x100] sm:$0xff] %vm1387_vm0, %v1785_v8  ;;  %1798 = vpow2.f32 %v1345_v4  ;;  %v1341_v3 = vmul.f32 1.442695, %v1238_v7  ;;  %v1241_v9 = vmul.f32 -0.1, %v1116_v2  ;;  %v1108_v56 = vadd.f32 %v1107_v14, %v819_v13  ;;  %v1608_v52 = vpop.f32.mrf.mxu0 }
 0x155   :  { %v1787_v12 = vpop.eup %1786  ;;  %v1688_v10 = vpop.f32.mrf.mxu1 }
 0x156   :  { %1423 = vst.msk [vmem:[%s2403_s4 + $0x118] sm:$0xff] %vm1387_vm0, %v1787_v12  ;;  %1800 = vpow2.f32 %v1341_v3  ;;  %v1347_v15 = vmul.f32 1.442695, %v1241_v9  ;;  %v1239_v16 = vmul.f32 -0.1, %v1108_v56  ;;  %v1129_v57 = vadd.f32 %v1688_v10, %v1608_v52  ;;  %v832_v1 = vpop.f32.mrf.mxu0 }
 0x157   :  { %v1789_v5 = vpop.eup %1788  ;;  %v1120_v17 = vpop.f32.mrf.mxu1 }
 0x158   :  { %1421 = vst.msk [vmem:[%s2403_s4 + $0x108] sm:$0xff] %vm1387_vm0, %v1789_v5  ;;  %1802 = vpow2.f32 %v1347_v15  ;;  %v1343_v6 = vmul.f32 1.442695, %v1239_v16  ;;  %v1244_v62 = vmul.f32 -0.1, %v1129_v57  ;;  %v1121_v18 = vadd.f32 %v1120_v17, %v832_v1  ;;  %v1609_v59 = vpop.f32.mrf.mxu0 }
 0x159   :  { %v1791_v11 = vpop.eup %1790  ;;  %v1689_v48 = vpop.f32.mrf.mxu1 }
 0x15a   :  { %1426 = vst.msk [vmem:[%s2403_s4 + $0x130] sm:$0xff] %vm1387_vm0, %v1791_v11  ;;  %1804 = vpow2.f32 %v1343_v6  ;;  %v1353_v20 = vmul.f32 1.442695, %v1244_v62  ;;  %v1242_v21 = vmul.f32 -0.1, %v1121_v18  ;;  %v1132_v22 = vadd.f32 %v1689_v48, %v1609_v59  ;;  %v835_v26 = vpop.f32.mrf.mxu0 }
 0x15b   :  { %v1793_v23 = vpop.eup %1792  ;;  %v1123_v27 = vpop.f32.mrf.mxu1 }
 0x15c   :  { %1424 = vst.msk [vmem:[%s2403_s4 + $0x120] sm:$0xff] %vm1387_vm0, %v1793_v23  ;;  %1806 = vpow2.f32 %v1353_v20  ;;  %v1349_v33 = vmul.f32 1.442695, %v1242_v21  ;;  %v1245_v35 = vmul.f32 -0.1, %v1132_v22  ;;  %v1124_v36 = vadd.f32 %v1123_v27, %v835_v26  ;;  %v1612_v39 = vpop.f32.mrf.mxu0 }
 0x15d   :  { %v1795_v37 = vpop.eup %1794  ;;  %v1692_v41 = vpop.f32.mrf.mxu1 }
 0x15e   :  { %1427 = vst.msk [vmem:[%s2403_s4 + $0x138] sm:$0xff] %vm1387_vm0, %v1795_v37  ;;  %1808 = vpow2.f32 %v1349_v33  ;;  %v1355_v19 = vmul.f32 1.442695, %v1245_v35  ;;  %v1243_v42 = vmul.f32 -0.1, %v1124_v36  ;;  %v1145_v45 = vadd.f32 %v1692_v41, %v1612_v39  ;;  %v848_v24 = vpop.f32.mrf.mxu0 }
 0x15f   :  { %v1797_v46 = vpop.eup %1796  ;;  %v1136_v30 = vpop.f32.mrf.mxu1 }
 0x160   :  { %1425 = vst.msk [vmem:[%s2403_s4 + $0x128] sm:$0xff] %vm1387_vm0, %v1797_v46  ;;  %1810 = vpow2.f32 %v1355_v19  ;;  %v1351_v44 = vmul.f32 1.442695, %v1243_v42  ;;  %v1248_v47 = vmul.f32 -0.1, %v1145_v45  ;;  %v1137_v49 = vadd.f32 %v1136_v30, %v848_v24  ;;  %v1613_v32 = vpop.f32.mrf.mxu0 }
 0x161   :  { %v1799_v29 = vpop.eup %1798  ;;  %v1693_v28 = vpop.f32.mrf.mxu1 }
 0x162   :  { %1430 = vst.msk [vmem:[%s2403_s4 + $0x150] sm:$0xff] %vm1387_vm0, %v1799_v29  ;;  %1812 = vpow2.f32 %v1351_v44  ;;  %v1361_v25 = vmul.f32 1.442695, %v1248_v47  ;;  %v1246_v50 = vmul.f32 -0.1, %v1137_v49  ;;  %v1148_v38 = vadd.f32 %v1693_v28, %v1613_v32  ;;  %v851_v51 = vpop.f32.mrf.mxu0 }
 0x163   :  { %v1801_v31 = vpop.eup %1800  ;;  %v1139_v34 = vpop.f32.mrf.mxu1 }
 0x164   :  { %1428 = vst.msk [vmem:[%s2403_s4 + $0x140] sm:$0xff] %vm1387_vm0, %v1801_v31  ;;  %1814 = vpow2.f32 %v1361_v25  ;;  %v1357_v53 = vmul.f32 1.442695, %v1246_v50  ;;  %v1249_v40 = vmul.f32 -0.1, %v1148_v38  ;;  %v1140_v43 = vadd.f32 %v1139_v34, %v851_v51  ;;  %v1616_v55 = vpop.f32.mrf.mxu0 }
 0x165   :  { %v1803_v54 = vpop.eup %1802  ;;  %v1696_v58 = vpop.f32.mrf.mxu1 }
 0x166   :  { %1431 = vst.msk [vmem:[%s2403_s4 + $0x158] sm:$0xff] %vm1387_vm0, %v1803_v54  ;;  %1816 = vpow2.f32 %v1357_v53  ;;  %v1363_v60 = vmul.f32 1.442695, %v1249_v40  ;;  %v1247_v61 = vmul.f32 -0.1, %v1140_v43  ;;  %v1161_v63 = vadd.f32 %v1696_v58, %v1616_v55  ;;  %v864_v4 = vpop.f32.mrf.mxu0 }
 0x167   :  { %v1805_v0 = vpop.eup %1804  ;;  %v1152_v7 = vpop.f32.mrf.mxu1 }
 0x168   :  { %1429 = vst.msk [vmem:[%s2403_s4 + $0x148] sm:$0xff] %vm1387_vm0, %v1805_v0  ;;  %1818 = vpow2.f32 %v1363_v60  ;;  %v1359_v2 = vmul.f32 1.442695, %v1247_v61  ;;  %v1252_v8 = vmul.f32 -0.1, %v1161_v63  ;;  %v1153_v13 = vadd.f32 %v1152_v7, %v864_v4  ;;  %v1617_v3 = vpop.f32.mrf.mxu0 }
 0x169   :  { %v1807_v14 = vpop.eup %1806  ;;  %v1697_v9 = vpop.f32.mrf.mxu1 }
 0x16a   :  { %1434 = vst.msk [vmem:[%s2403_s4 + $0x170] sm:$0xff] %vm1387_vm0, %v1807_v14  ;;  %1820 = vpow2.f32 %v1359_v2  ;;  %v1369_v56 = vmul.f32 1.442695, %v1252_v8  ;;  %v1250_v12 = vmul.f32 -0.1, %v1153_v13  ;;  %v1164_v52 = vadd.f32 %v1697_v9, %v1617_v3  ;;  %v867_v15 = vpop.f32.mrf.mxu0 }
 0x16b   :  { %v1809_v10 = vpop.eup %1808  ;;  %v1155_v16 = vpop.f32.mrf.mxu1 }
 0x16c   :  { %1432 = vst.msk [vmem:[%s2403_s4 + $0x160] sm:$0xff] %vm1387_vm0, %v1809_v10  ;;  %1822 = vpow2.f32 %v1369_v56  ;;  %v1365_v57 = vmul.f32 1.442695, %v1250_v12  ;;  %v1253_v5 = vmul.f32 -0.1, %v1164_v52  ;;  %v1156_v1 = vadd.f32 %v1155_v16, %v867_v15  ;;  %v1620_v6 = vpop.f32.mrf.mxu0 }
 0x16d   :  { %v1811_v17 = vpop.eup %1810  ;;  %v1700_v62 = vpop.f32.mrf.mxu1 }
 0x16e   :  { %1435 = vst.msk [vmem:[%s2403_s4 + $0x178] sm:$0xff] %vm1387_vm0, %v1811_v17  ;;  %1824 = vpow2.f32 %v1365_v57  ;;  %v1371_v18 = vmul.f32 1.442695, %v1253_v5  ;;  %v1251_v11 = vmul.f32 -0.1, %v1156_v1  ;;  %v1177_v59 = vadd.f32 %v1700_v62, %v1620_v6  ;;  %v880_v20 = vpop.f32.mrf.mxu0 }
 0x16f   :  { %v1813_v48 = vpop.eup %1812  ;;  %v1168_v21 = vpop.f32.mrf.mxu1 }
 0x170   :  { %1433 = vst.msk [vmem:[%s2403_s4 + $0x168] sm:$0xff] %vm1387_vm0, %v1813_v48  ;;  %1826 = vpow2.f32 %v1371_v18  ;;  %v1367_v22 = vmul.f32 1.442695, %v1251_v11  ;;  %v1256_v23 = vmul.f32 -0.1, %v1177_v59  ;;  %v1169_v26 = vadd.f32 %v1168_v21, %v880_v20  ;;  %v1621_v33 = vpop.f32.mrf.mxu0 }
 0x171   :  { %v1815_v27 = vpop.eup %1814  ;;  %v1701_v35 = vpop.f32.mrf.mxu1 }
 0x172   :  { %1438 = vst.msk [vmem:[%s2403_s4 + $0x190] sm:$0xff] %vm1387_vm0, %v1815_v27  ;;  %1828 = vpow2.f32 %v1367_v22  ;;  %v1377_v36 = vmul.f32 1.442695, %v1256_v23  ;;  %v1254_v37 = vmul.f32 -0.1, %v1169_v26  ;;  %v1180_v39 = vadd.f32 %v1701_v35, %v1621_v33  ;;  %v883_v19 = vpop.f32.mrf.mxu0 }
 0x173   :  { %v1817_v41 = vpop.eup %1816  ;;  %v1171_v42 = vpop.f32.mrf.mxu1 }
 0x174   :  { %1436 = vst.msk [vmem:[%s2403_s4 + $0x180] sm:$0xff] %vm1387_vm0, %v1817_v41  ;;  %1830 = vpow2.f32 %v1377_v36  ;;  %v1373_v45 = vmul.f32 1.442695, %v1254_v37  ;;  %v1257_v46 = vmul.f32 -0.1, %v1180_v39  ;;  %v1172_v24 = vadd.f32 %v1171_v42, %v883_v19  ;;  %v1624_v44 = vpop.f32.mrf.mxu0 }
 0x175   :  { %v1819_v30 = vpop.eup %1818  ;;  %v1704_v47 = vpop.f32.mrf.mxu1 }
 0x176   :  { %1439 = vst.msk [vmem:[%s2403_s4 + $0x198] sm:$0xff] %vm1387_vm0, %v1819_v30  ;;  %1832 = vpow2.f32 %v1373_v45  ;;  %v1379_v49 = vmul.f32 1.442695, %v1257_v46  ;;  %v1255_v29 = vmul.f32 -0.1, %v1172_v24  ;;  %v1193_v32 = vadd.f32 %v1704_v47, %v1624_v44  ;;  %v896_v25 = vpop.f32.mrf.mxu0 }
 0x177   :  { %v1821_v28 = vpop.eup %1820  ;;  %v1184_v50 = vpop.f32.mrf.mxu1 }
 0x178   :  { %1437 = vst.msk [vmem:[%s2403_s4 + $0x188] sm:$0xff] %vm1387_vm0, %v1821_v28  ;;  %1834 = vpow2.f32 %v1379_v49  ;;  %v1375_v38 = vmul.f32 1.442695, %v1255_v29  ;;  %v1260_v31 = vmul.f32 -0.1, %v1193_v32  ;;  %v1185_v51 = vadd.f32 %v1184_v50, %v896_v25  ;;  %v1625_v53 = vpop.f32.mrf.mxu0 }
 0x179   :  { %v1823_v34 = vpop.eup %1822  ;;  %v1705_v40 = vpop.f32.mrf.mxu1 }
 0x17a   :  { %1442 = vst.msk [vmem:[%s2403_s4 + $0x1b0] sm:$0xff] %vm1387_vm0, %v1823_v34  ;;  %1836 = vpow2.f32 %v1375_v38  ;;  %v1385_v43 = vmul.f32 1.442695, %v1260_v31  ;;  %v1258_v54 = vmul.f32 -0.1, %v1185_v51  ;;  %v899_v58 = vpop.f32.mrf.mxu0 }
 0x17b   :  { %v1825_v55 = vpop.eup %1824  ;;  %v1187_v60 = vpop.f32.mrf.mxu1 }
 0x17c   :  { %1440 = vst.msk [vmem:[%s2403_s4 + $0x1a0] sm:$0xff] %vm1387_vm0, %v1825_v55  ;;  %1838 = vpow2.f32 %v1385_v43  ;;  %v1381_v61 = vmul.f32 1.442695, %v1258_v54  ;;  %v1188_v63 = vadd.f32 %v1187_v60, %v899_v58 }
 0x17d   :  { %v1827_v0 = vpop.eup %1826 }
 0x17e   :  { %1443 = vst.msk [vmem:[%s2403_s4 + $0x1b8] sm:$0xff] %vm1387_vm0, %v1827_v0  ;;  %1840 = vpow2.f32 %v1381_v61  ;;  %v1259_v4 = vmul.f32 -0.1, %v1188_v63 }
 0x17f   :  { %v1829_v7 = vpop.eup %1828 }
 0x180   :  { %1441 = vst.msk [vmem:[%s2403_s4 + $0x1a8] sm:$0xff] %vm1387_vm0, %v1829_v7  ;;  %v1383_v2 = vmul.f32 1.442695, %v1259_v4 }
 0x181   :  { %v1831_v8 = vpop.eup %1830 }
 0x182   :  { %1446 = vst.msk [vmem:[%s2403_s4 + $0x1d0] sm:$0xff] %vm1387_vm0, %v1831_v8  ;;  %1842 = vpow2.f32 %v1383_v2 }
 0x183   :  { %v1833_v13 = vpop.eup %1832 }
 0x184   :  { %1444 = vst.msk [vmem:[%s2403_s4 + $0x1c0] sm:$0xff] %vm1387_vm0, %v1833_v13 }
 0x185   :  { %v1835_v14 = vpop.eup %1834 }
 0x186   :  { %1447 = vst.msk [vmem:[%s2403_s4 + $0x1d8] sm:$0xff] %vm1387_vm0, %v1835_v14 }
 0x187   :  { %v1837_v3 = vpop.eup %1836 }
 0x188   :  { %1445 = vst.msk [vmem:[%s2403_s4 + $0x1c8] sm:$0xff] %vm1387_vm0, %v1837_v3 }
 0x189   :  { %v1839_v9 = vpop.eup %1838 }
 0x18a   :  { %1450 = vst.msk [vmem:[%s2403_s4 + $0x1f0] sm:$0xff] %vm1387_vm0, %v1839_v9 }
 0x18b   :  { %v1841_v56 = vpop.eup %1840 }
 0x18c   :  { %1448 = vst.msk [vmem:[%s2403_s4 + $0x1e0] sm:$0xff] %vm1387_vm0, %v1841_v56 }
 0x18f   :  { %v1843_v12 = vpop.eup %1842 }
 0x190   :  { %1449 = vst.msk [vmem:[%s2403_s4 + $0x1e8] sm:$0xff] %vm1387_vm0, %v1843_v12 }
 0x191   :  { %1455 = vsyncpa [#allocation3], 1 }
 0x192   :  { %1456 = vsyncpa [#allocation5], 1 }

</bundles_post_ra>
